<compile_context>
chip_gen: v7x
topology: tpu7x:2x2x1
jax: 0.10.0
libtpu: 0.0.40
codegen_flags: <defaults>
</compile_context>

<pallas_src>
import jax
import jax.numpy as jnp
import numpy as np
from jax.experimental import pallas as pl
from jax.experimental.pallas import tpu as pltpu

SUBLANE = 8
LANE = 128


def _round_up(x, m):
    return (x + m - 1) // m * m


def decoder_kernel(embed_ref, h0_ref, ctx0_ref, enc_ref,
                   attwq_ref, wihe_ref, wihc_ref, whh_ref, bih_ref, bhh_ref,
                   conwc_ref, conwh_ref, conb_ref, outw_ref, outb_ref,
                   logp_ref, attnw_ref, hfin_ref, ctxfin_ref,
                   h_sc, ctx_sc):
    t = pl.program_id(0)
    T = pl.num_programs(0)
    H = h_sc.shape[-1]
    cdt = wihe_ref.dtype                     # matmul compute dtype (bf16)

    # ---- carry init: load h0 / ctx0 into the VMEM-resident state at t==0 ----
    @pl.when(t == 0)
    def _():
        h_sc[...] = h0_ref[...]
        ctx_sc[...] = ctx0_ref[...]

    embed = embed_ref[...]                   # (Bp, E) bf16 (gathered in wrapper)
    h = h_sc[...]                            # (Bp, H) f32
    ctx = ctx_sc[...]                        # (Bp, H) f32

    # ---- GRU cell: split matmuls (no concat, no zero-padded weight) ----------
    gi = (jnp.dot(embed, wihe_ref[...], preferred_element_type=jnp.float32)
          + jnp.dot(ctx.astype(cdt), wihc_ref[...],
                    preferred_element_type=jnp.float32)
          + bih_ref[...])                                            # (Bp, 3H)
    gh = (jnp.dot(h.astype(cdt), whh_ref[...],
                  preferred_element_type=jnp.float32)
          + bhh_ref[...])                                            # (Bp, 3H)
    r = jax.nn.sigmoid(gi[:, 0 * H:1 * H] + gh[:, 0 * H:1 * H])
    z = jax.nn.sigmoid(gi[:, 1 * H:2 * H] + gh[:, 1 * H:2 * H])
    n = jnp.tanh(gi[:, 2 * H:3 * H] + r * gh[:, 2 * H:3 * H])
    h_new = (1.0 - z) * n + z * h                                    # (Bp, H)

    # ---- Luong general attention (query-side projection; no (B,S,H) input) ---
    # logits[b,s] = sum_h enc[b,s,h] * (h_new @ attw_q)[b,h]
    # (the attention bias contributes a per-row constant -> cancels in softmax)
    q = jnp.dot(h_new.astype(cdt), attwq_ref[...],
                preferred_element_type=jnp.float32)                  # (Bp, H)
    enc = enc_ref[...]                                               # (Bp, S, H)
    logits = jnp.sum(enc * q[:, None, :], axis=2)                    # (Bp, S)
    m = jnp.max(logits, axis=1, keepdims=True)
    e = jnp.exp(logits - m)
    weights = e / jnp.sum(e, axis=1, keepdims=True)                  # exact div
    ctx_new = jnp.sum(weights[:, :, None] * enc, axis=1)             # (Bp, H)

    # ---- concat layer (split matmuls) -> tanh -> padded out proj -> log_softmax
    hc = jnp.tanh(jnp.dot(ctx_new.astype(cdt), conwc_ref[...],
                          preferred_element_type=jnp.float32)
                  + jnp.dot(h_new.astype(cdt), conwh_ref[...],
                            preferred_element_type=jnp.float32)
                  + conb_ref[...])                                   # (Bp, 2H)
    out = (jnp.dot(hc.astype(cdt), outw_ref[...],
                   preferred_element_type=jnp.float32)
           + outb_ref[...])                                          # (Bp, Vp)
    mo = jnp.max(out, axis=1, keepdims=True)
    lse = mo + jnp.log(jnp.sum(jnp.exp(out - mo), axis=1, keepdims=True))
    logp_ref[...] = out - lse                                        # lane-dense
    attnw_ref[...] = weights

    # ---- carry update; final state written back only once at the last step ---
    h_sc[...] = h_new
    ctx_sc[...] = ctx_new

    @pl.when(t == T - 1)
    def _():
        hfin_ref[...] = h_new
        ctxfin_ref[...] = ctx_new


def pack_params(params, dtype=jnp.bfloat16):
    """One-time repack of PyTorch-layout params into the kernel's layout."""
    V, E = params["emb"].shape
    H = params["whh_t"].shape[0]
    Vp = _round_up(V, LANE)
    wih_t = params["wih_t"]                                  # (E+H, 3H)

    # Output projection padded to a 128-lane-dense vocab; padded bias = -1e30
    # (finite in f32/bf16) so the in-kernel log-softmax ignores pad columns.
    outw_p = jnp.zeros((2 * H, Vp), jnp.float32).at[:, :V].set(params["outw_t"])
    outb_p = jnp.full((1, Vp), -1e30, jnp.float32).at[:, :V].set(params["outb"])

    return {
        # bf16 matmul operands (f32 MXU accumulation in-kernel)
        "emb":    params["emb"].astype(dtype),               # (V, E)
        "wih_e":  wih_t[:E].astype(dtype),                   # (E, 3H)
        "wih_c":  wih_t[E:].astype(dtype),                   # (H, 3H)
        "whh":    params["whh_t"].astype(dtype),             # (H, 3H)
        "attw_q": params["attw_t"].T.astype(dtype),          # (H, H): q = h @ Wq
        "conw_c": params["conw_t"][:H].astype(dtype),        # (H, 2H)
        "conw_h": params["conw_t"][H:].astype(dtype),        # (H, 2H)
        "outw":   outw_p.astype(dtype),                      # (2H, Vp)
        # biases stay f32 (not MXU operands)
        "bih":    params["bih"].astype(jnp.float32),
        "bhh":    params["bhh"].astype(jnp.float32),
        "conb":   params["conb"].astype(jnp.float32),
        "outb":   outb_p,                                    # (1, Vp), pad=-1e30
        "V": V, "Vp": Vp, "E": E, "H": H,
    }


def decoder_decode(ids_T, hidden, encoder_output, context, packed):
    """Run T teacher-forced decode steps in one pallas_call.

    ids_T: (T, B) int32, hidden: (1, B, H), encoder_output: (B, S, H),
    context: (B, 1, H).
    Returns (logp (T,B,V), attn_weights (T,B,S), hidden (1,B,H), context (B,1,H)).
    """
    T, B = ids_T.shape
    S = encoder_output.shape[1]
    H, E, V, Vp = packed["H"], packed["E"], packed["V"], packed["Vp"]
    Bp = _round_up(B, SUBLANE)
    cdt = packed["emb"].dtype

    # Embedding gather hoisted out of the kernel (all T steps at once).
    embed_all = packed["emb"][ids_T.astype(jnp.int32)]               # (T, B, E)
    embed_p = jnp.zeros((T, Bp, E), cdt).at[:, :B].set(embed_all)
    h0_p = jnp.zeros((Bp, H), jnp.float32).at[:B].set(hidden[0])
    ctx0_p = jnp.zeros((Bp, H), jnp.float32).at[:B].set(context[:, 0, :])
    enc_p = jnp.zeros((Bp, S, H), jnp.float32).at[:B].set(encoder_output)

    weight_args = [packed[k] for k in ("attw_q", "wih_e", "wih_c", "whh", "bih",
                                       "bhh", "conw_c", "conw_h", "conb",
                                       "outw", "outb")]

    const2 = lambda t: (0, 0)
    const3 = lambda t: (0, 0, 0)
    step3 = lambda t: (t, 0, 0)

    in_specs = (
        [pl.BlockSpec((None, Bp, E), step3),          # per-step embeddings
         pl.BlockSpec((Bp, H), const2),               # h0   (read at t==0)
         pl.BlockSpec((Bp, H), const2),               # ctx0 (read at t==0)
         pl.BlockSpec((Bp, S, H), const3)]            # encoder output (resident)
        + [pl.BlockSpec(w.shape, const2) for w in weight_args]   # VMEM-resident
    )
    out_specs = (
        pl.BlockSpec((None, Bp, Vp), step3),          # logp  (lane-dense)
        pl.BlockSpec((None, Bp, S), step3),           # attention weights
        pl.BlockSpec((Bp, H), const2),                # final hidden
        pl.BlockSpec((Bp, H), const2),                # final context
    )
    out_shape = (
        jax.ShapeDtypeStruct((T, Bp, Vp), jnp.float32),
        jax.ShapeDtypeStruct((T, Bp, S), jnp.float32),
        jax.ShapeDtypeStruct((Bp, H), jnp.float32),
        jax.ShapeDtypeStruct((Bp, H), jnp.float32),
    )

    # Explicit VMEM budget: resident weights/enc + double-buffered per-step
    # blocks + scratch, with generous headroom (capped at v7x's 64 MiB).
    resident = sum(int(np.prod(a.shape)) * a.dtype.itemsize for a in weight_args)
    resident += enc_p.nbytes + h0_p.nbytes + ctx0_p.nbytes
    per_step = 2 * (Bp * E * jnp.dtype(cdt).itemsize + Bp * Vp * 4 + Bp * S * 4)
    scratch = 2 * Bp * H * 4
    vmem_limit = int(min(max(4 * (resident + per_step + scratch), 32 * 2 ** 20),
                         64 * 2 ** 20))

    logp, attnw, h_fin, ctx_fin = pl.pallas_call(
        decoder_kernel,
        out_shape=out_shape,
        grid=(T,),
        in_specs=in_specs,
        out_specs=out_specs,
        scratch_shapes=[pltpu.VMEM((Bp, H), jnp.float32),   # carried h
                        pltpu.VMEM((Bp, H), jnp.float32)],  # carried ctx
        compiler_params=pltpu.CompilerParams(
            dimension_semantics=("arbitrary",),             # sequential recurrence
            vmem_limit_bytes=vmem_limit),
    )(embed_p, h0_p, ctx0_p, enc_p, *weight_args)

    return (logp[:, :B, :V], attnw[:, :B, :],
            h_fin[:B][None], ctx_fin[:B][:, None, :])


def decoder_forward(ids, hidden, encoder_output, context, packed):
    """Single decode step matching DecoderRNN.forward (attention=True) shapes:
    returns (logp (B,V), hidden (1,B,H), context (B,1,H), weights (B,1,S))."""
    logp, attnw, h_new, ctx_new = decoder_decode(
        ids[None, :], hidden, encoder_output, context, packed)
    return logp[0], h_new, ctx_new, attnw[0][:, None, :]


# ---------------------------- pure-JAX reference -----------------------------

def reference_step(ids, h, enc, ctx, p):
    """One DecoderRNN forward step (attention=True), f32, PyTorch semantics."""
    H = h.shape[1]
    embed = p["emb"][ids]
    x = jnp.concatenate([embed, ctx], axis=1)
    gi = x @ p["wih_t"] + p["bih"]
    gh = h @ p["whh_t"] + p["bhh"]
    r = jax.nn.sigmoid(gi[:, :H] + gh[:, :H])
    z = jax.nn.sigmoid(gi[:, H:2 * H] + gh[:, H:2 * H])
    n = jnp.tanh(gi[:, 2 * H:] + r * gh[:, 2 * H:])
    h_new = (1 - z) * n + z * h
    proj = (enc.reshape(-1, H) @ p["attw_t"] + p["attb"]).reshape(enc.shape)
    logits = jnp.einsum("bsh,bh->bs", proj, h_new)
    w = jax.nn.softmax(logits, axis=1)
    ctx_new = jnp.einsum("bs,bsh->bh", w, enc)
    hc = jnp.tanh(jnp.concatenate([ctx_new, h_new], axis=1) @ p["conw_t"]
                  + p["conb"])
    out = hc @ p["outw_t"] + p["outb"]
    return jax.nn.log_softmax(out, axis=1), h_new, ctx_new, w


def reference_decode(ids_T, hidden, enc, context, p):
    h, ctx = hidden[0], context[:, 0, :]
    logps, ws = [], []
    for t in range(ids_T.shape[0]):
        logp, h, ctx, w = reference_step(ids_T[t], h, enc, ctx, p)
        logps.append(logp)
        ws.append(w)
    return jnp.stack(logps), jnp.stack(ws), h[None], ctx[:, None, :]


def init_params(key, V, E, H):
    ks = jax.random.split(key, 12)
    u = lambda k, shape, s: jax.random.uniform(k, shape, jnp.float32, -s, s)
    rnn_in = E + H
    return {
        "emb":    u(ks[0], (V, E), 0.1),
        # GRU weights, PyTorch layout (3H, in) transposed -> (in, 3H)
        "wih_t":  u(ks[1], (rnn_in, 3 * H), 1.0 / np.sqrt(H)),
        "bih":    u(ks[2], (1, 3 * H), 1.0 / np.sqrt(H)),
        "whh_t":  u(ks[3], (H, 3 * H), 1.0 / np.sqrt(H)),
        "bhh":    u(ks[4], (1, 3 * H), 1.0 / np.sqrt(H)),
        # Attention Linear(H, H)
        "attw_t": u(ks[5], (H, H), 1.0 / np.sqrt(H)),
        "attb":   u(ks[6], (1, H), 1.0 / np.sqrt(H)),
        # concat Linear(2H, 2H)
        "conw_t": u(ks[7], (2 * H, 2 * H), 1.0 / np.sqrt(2 * H)),
        "conb":   u(ks[8], (1, 2 * H), 1.0 / np.sqrt(2 * H)),
        # out Linear(2H, V)
        "outw_t": u(ks[9], (2 * H, V), 1.0 / np.sqrt(2 * H)),
        "outb":   u(ks[10], (1, V), 1.0 / np.sqrt(2 * H)),
    }


if __name__ == "__main__":
    V, E, H = 50, 32, 32   # output_size (vocab), embedding_size, hidden_size
    B, S, T = 2, 8, 4      # batch, encoder seq length, decode steps

    key = jax.random.PRNGKey(0)
    kp, k1, k2, k3, k4 = jax.random.split(key, 5)
    params = init_params(kp, V, E, H)
    packed = pack_params(params)        # bf16 weights, split GRU/concat, padded vocab

    ids_T = jax.random.randint(k1, (T, B), 0, V, dtype=jnp.int32)
    hidden = jax.random.normal(k2, (1, B, H), jnp.float32)
    encoder_output = jax.random.normal(k3, (B, S, H), jnp.float32)
    context = jax.random.normal(k4, (B, 1, H), jnp.float32)

    # Multi-step (gridded) decode: T module-forward steps in one pallas_call.
    outs = decoder_decode(ids_T, hidden, encoder_output, context, packed)
    jax.block_until_ready(outs)

    ref = reference_decode(ids_T, hidden, encoder_output, context, params)
    # 5e-2 tolerance: matmul operands (weights + activations) are bf16 with f32
    # accumulation, compared against the pure-f32 PyTorch-equivalent reference.
    for got, want in zip(outs, ref):
        np.testing.assert_allclose(np.asarray(got), np.asarray(want),
                                   rtol=5e-2, atol=5e-2)

    # Single-step path with the module's exact return shapes (T=1).
    step = decoder_forward(ids_T[0], hidden, encoder_output, context, packed)
    jax.block_until_ready(step)
    r0 = reference_step(ids_T[0], hidden[0], encoder_output, context[:, 0, :],
                        params)
    np.testing.assert_allclose(np.asarray(step[0]), np.asarray(r0[0]),
                               rtol=5e-2, atol=5e-2)
    assert step[0].shape == (B, V) and step[1].shape == (1, B, H)
    assert step[2].shape == (B, 1, H) and step[3].shape == (B, 1, S)

    print("KERNEL_OK")
</pallas_src>

<mosaic_0001>
module attributes {stable_mosaic.version = 11 : i64} {
  func.func @decoder_kernel(%arg0: i32, %arg1: memref<1x8x32xbf16, #tpu.memory_space<vmem>>, %arg2: memref<8x32xf32, #tpu.memory_space<vmem>>, %arg3: memref<8x32xf32, #tpu.memory_space<vmem>>, %arg4: memref<8x8x32xf32, #tpu.memory_space<vmem>>, %arg5: memref<32x32xbf16, #tpu.memory_space<vmem>>, %arg6: memref<32x96xbf16, #tpu.memory_space<vmem>>, %arg7: memref<32x96xbf16, #tpu.memory_space<vmem>>, %arg8: memref<32x96xbf16, #tpu.memory_space<vmem>>, %arg9: memref<1x96xf32, #tpu.memory_space<vmem>>, %arg10: memref<1x96xf32, #tpu.memory_space<vmem>>, %arg11: memref<32x64xbf16, #tpu.memory_space<vmem>>, %arg12: memref<32x64xbf16, #tpu.memory_space<vmem>>, %arg13: memref<1x64xf32, #tpu.memory_space<vmem>>, %arg14: memref<64x128xbf16, #tpu.memory_space<vmem>>, %arg15: memref<1x128xf32, #tpu.memory_space<vmem>>, %arg16: memref<1x8x128xf32, #tpu.memory_space<vmem>>, %arg17: memref<1x8x8xf32, #tpu.memory_space<vmem>>, %arg18: memref<8x32xf32, #tpu.memory_space<vmem>>, %arg19: memref<8x32xf32, #tpu.memory_space<vmem>>, %arg20: memref<8x32xf32, #tpu.memory_space<vmem>>, %arg21: memref<8x32xf32, #tpu.memory_space<vmem>>) attributes {dimension_semantics = [#tpu.dimension_semantics<arbitrary>], iteration_bounds = array<i64: 4>, scalar_prefetch = 0 : i64, scratch_operands = 2 : i64, tpu.core_type = #tpu.core_type<tc>, window_params = [{transform_indices = @transform_0, window_bounds = array<i64: 1, 8, 32>}, {pipeline_mode = #tpu.pipeline_mode<synchronous>, transform_indices = @transform_1, window_bounds = array<i64: 8, 32>}, {pipeline_mode = #tpu.pipeline_mode<synchronous>, transform_indices = @transform_2, window_bounds = array<i64: 8, 32>}, {pipeline_mode = #tpu.pipeline_mode<synchronous>, transform_indices = @transform_3, window_bounds = array<i64: 8, 8, 32>}, {pipeline_mode = #tpu.pipeline_mode<synchronous>, transform_indices = @transform_4, window_bounds = array<i64: 32, 32>}, {pipeline_mode = #tpu.pipeline_mode<synchronous>, transform_indices = @transform_5, window_bounds = array<i64: 32, 96>}, {pipeline_mode = #tpu.pipeline_mode<synchronous>, transform_indices = @transform_6, window_bounds = array<i64: 32, 96>}, {pipeline_mode = #tpu.pipeline_mode<synchronous>, transform_indices = @transform_7, window_bounds = array<i64: 32, 96>}, {pipeline_mode = #tpu.pipeline_mode<synchronous>, transform_indices = @transform_8, window_bounds = array<i64: 1, 96>}, {pipeline_mode = #tpu.pipeline_mode<synchronous>, transform_indices = @transform_9, window_bounds = array<i64: 1, 96>}, {pipeline_mode = #tpu.pipeline_mode<synchronous>, transform_indices = @transform_10, window_bounds = array<i64: 32, 64>}, {pipeline_mode = #tpu.pipeline_mode<synchronous>, transform_indices = @transform_11, window_bounds = array<i64: 32, 64>}, {pipeline_mode = #tpu.pipeline_mode<synchronous>, transform_indices = @transform_12, window_bounds = array<i64: 1, 64>}, {pipeline_mode = #tpu.pipeline_mode<synchronous>, transform_indices = @transform_13, window_bounds = array<i64: 64, 128>}, {pipeline_mode = #tpu.pipeline_mode<synchronous>, transform_indices = @transform_14, window_bounds = array<i64: 1, 128>}, {transform_indices = @transform_15, window_bounds = array<i64: 1, 8, 128>}, {transform_indices = @transform_16, window_bounds = array<i64: 1, 8, 8>}, {pipeline_mode = #tpu.pipeline_mode<synchronous>, transform_indices = @transform_17, window_bounds = array<i64: 8, 32>}, {pipeline_mode = #tpu.pipeline_mode<synchronous>, transform_indices = @transform_18, window_bounds = array<i64: 8, 32>}]} {
    %c0_i32 = arith.constant 0 : i32
    %0 = arith.cmpi eq, %arg0, %c0_i32 : i32
    %1 = arith.extui %0 : i1 to i32
    %c0_i32_0 = arith.constant 0 : i32
    %2 = arith.cmpi ne, %1, %c0_i32_0 : i32
    scf.if %2 {
      %c0_58 = arith.constant 0 : index
      %c0_59 = arith.constant 0 : index
      %108 = vector.load %arg2[%c0_58, %c0_59] : memref<8x32xf32, #tpu.memory_space<vmem>>, vector<8x32xf32>
      %c0_60 = arith.constant 0 : index
      %c0_61 = arith.constant 0 : index
      %109 = vector.load %arg20[%c0_60, %c0_61] : memref<8x32xf32, #tpu.memory_space<vmem>>, vector<8x32xf32>
      tpu.vector_store %arg20[%c0_60, %c0_61], %108 {strides = array<i32>} : memref<8x32xf32, #tpu.memory_space<vmem>>, vector<8x32xf32>,
      %c0_62 = arith.constant 0 : index
      %c0_63 = arith.constant 0 : index
      %110 = vector.load %arg3[%c0_62, %c0_63] : memref<8x32xf32, #tpu.memory_space<vmem>>, vector<8x32xf32>
      %c0_64 = arith.constant 0 : index
      %c0_65 = arith.constant 0 : index
      %111 = vector.load %arg21[%c0_64, %c0_65] : memref<8x32xf32, #tpu.memory_space<vmem>>, vector<8x32xf32>
      tpu.vector_store %arg21[%c0_64, %c0_65], %110 {strides = array<i32>} : memref<8x32xf32, #tpu.memory_space<vmem>>, vector<8x32xf32>,
    } else {
    }
    %c0 = arith.constant 0 : index
    %c0_1 = arith.constant 0 : index
    %c0_2 = arith.constant 0 : index
    %3 = vector.load %arg1[%c0, %c0_1, %c0_2] : memref<1x8x32xbf16, #tpu.memory_space<vmem>>, vector<1x8x32xbf16>
    %4 = vector.shape_cast %3 : vector<1x8x32xbf16> to vector<8x32xbf16>
    %c0_3 = arith.constant 0 : index
    %c0_4 = arith.constant 0 : index
    %5 = vector.load %arg20[%c0_3, %c0_4] : memref<8x32xf32, #tpu.memory_space<vmem>>, vector<8x32xf32>
    %c0_5 = arith.constant 0 : index
    %c0_6 = arith.constant 0 : index
    %6 = vector.load %arg21[%c0_5, %c0_6] : memref<8x32xf32, #tpu.memory_space<vmem>>, vector<8x32xf32>
    %c0_7 = arith.constant 0 : index
    %c0_8 = arith.constant 0 : index
    %7 = vector.load %arg6[%c0_7, %c0_8] : memref<32x96xbf16, #tpu.memory_space<vmem>>, vector<32x96xbf16>
    %cst = arith.constant dense<0.000000e+00> : vector<8x96xf32>
    %8 = tpu.matmul %4, %7, %cst {dimension_numbers = #tpu.dot_dimension_numbers<[1], [0], [0], [1], [0, 0, 1, 1], [], []>} : vector<8x32xbf16>, vector<32x96xbf16>, vector<8x96xf32> -> vector<8x96xf32>
    %9 = arith.truncf %6 : vector<8x32xf32> to vector<8x32xbf16>
    %c0_9 = arith.constant 0 : index
    %c0_10 = arith.constant 0 : index
    %10 = vector.load %arg7[%c0_9, %c0_10] : memref<32x96xbf16, #tpu.memory_space<vmem>>, vector<32x96xbf16>
    %cst_11 = arith.constant dense<0.000000e+00> : vector<8x96xf32>
    %11 = tpu.matmul %9, %10, %cst_11 {dimension_numbers = #tpu.dot_dimension_numbers<[1], [0], [0], [1], [0, 0, 1, 1], [], []>} : vector<8x32xbf16>, vector<32x96xbf16>, vector<8x96xf32> -> vector<8x96xf32>
    %12 = arith.addf %8, %11 : vector<8x96xf32>
    %c0_12 = arith.constant 0 : index
    %c0_13 = arith.constant 0 : index
    %13 = vector.load %arg9[%c0_12, %c0_13] : memref<1x96xf32, #tpu.memory_space<vmem>>, vector<1x96xf32>
    %14 = vector.broadcast %13 : vector<1x96xf32> to vector<8x96xf32>
    %15 = arith.addf %12, %14 : vector<8x96xf32>
    %16 = arith.truncf %5 : vector<8x32xf32> to vector<8x32xbf16>
    %c0_14 = arith.constant 0 : index
    %c0_15 = arith.constant 0 : index
    %17 = vector.load %arg8[%c0_14, %c0_15] : memref<32x96xbf16, #tpu.memory_space<vmem>>, vector<32x96xbf16>
    %cst_16 = arith.constant dense<0.000000e+00> : vector<8x96xf32>
    %18 = tpu.matmul %16, %17, %cst_16 {dimension_numbers = #tpu.dot_dimension_numbers<[1], [0], [0], [1], [0, 0, 1, 1], [], []>} : vector<8x32xbf16>, vector<32x96xbf16>, vector<8x96xf32> -> vector<8x96xf32>
    %c0_17 = arith.constant 0 : index
    %c0_18 = arith.constant 0 : index
    %19 = vector.load %arg10[%c0_17, %c0_18] : memref<1x96xf32, #tpu.memory_space<vmem>>, vector<1x96xf32>
    %20 = vector.broadcast %19 : vector<1x96xf32> to vector<8x96xf32>
    %21 = arith.addf %18, %20 : vector<8x96xf32>
    %22 = vector.extract_strided_slice %15 {offsets = [0, 0], sizes = [8, 32], strides = [1, 1]} : vector<8x96xf32> to vector<8x32xf32>
    %23 = vector.extract_strided_slice %21 {offsets = [0, 0], sizes = [8, 32], strides = [1, 1]} : vector<8x96xf32> to vector<8x32xf32>
    %24 = arith.addf %22, %23 : vector<8x32xf32>
    %25 = arith.negf %24 : vector<8x32xf32>
    %26 = math.exp %25 : vector<8x32xf32>
    %cst_19 = arith.constant 1.000000e+00 : f32
    %27 = vector.broadcast %cst_19 : f32 to vector<8x32xf32>
    %28 = arith.addf %27, %26 : vector<8x32xf32>
    %29 = arith.divf %27, %28 : vector<8x32xf32>
    %30 = vector.extract_strided_slice %15 {offsets = [0, 32], sizes = [8, 32], strides = [1, 1]} : vector<8x96xf32> to vector<8x32xf32>
    %31 = vector.extract_strided_slice %21 {offsets = [0, 32], sizes = [8, 32], strides = [1, 1]} : vector<8x96xf32> to vector<8x32xf32>
    %32 = arith.addf %30, %31 : vector<8x32xf32>
    %33 = arith.negf %32 : vector<8x32xf32>
    %34 = math.exp %33 : vector<8x32xf32>
    %cst_20 = arith.constant 1.000000e+00 : f32
    %35 = vector.broadcast %cst_20 : f32 to vector<8x32xf32>
    %36 = arith.addf %35, %34 : vector<8x32xf32>
    %37 = arith.divf %35, %36 : vector<8x32xf32>
    %38 = vector.extract_strided_slice %15 {offsets = [0, 64], sizes = [8, 32], strides = [1, 1]} : vector<8x96xf32> to vector<8x32xf32>
    %39 = vector.extract_strided_slice %21 {offsets = [0, 64], sizes = [8, 32], strides = [1, 1]} : vector<8x96xf32> to vector<8x32xf32>
    %40 = arith.mulf %29, %39 : vector<8x32xf32>
    %41 = arith.addf %38, %40 : vector<8x32xf32>
    %42 = math.tanh %41 : vector<8x32xf32>
    %cst_21 = arith.constant 1.000000e+00 : f32
    %43 = vector.broadcast %cst_21 : f32 to vector<8x32xf32>
    %44 = arith.subf %43, %37 : vector<8x32xf32>
    %45 = arith.mulf %44, %42 : vector<8x32xf32>
    %46 = arith.mulf %37, %5 : vector<8x32xf32>
    %47 = arith.addf %45, %46 : vector<8x32xf32>
    %48 = arith.truncf %47 : vector<8x32xf32> to vector<8x32xbf16>
    %c0_22 = arith.constant 0 : index
    %c0_23 = arith.constant 0 : index
    %49 = vector.load %arg5[%c0_22, %c0_23] : memref<32x32xbf16, #tpu.memory_space<vmem>>, vector<32x32xbf16>
    %cst_24 = arith.constant dense<0.000000e+00> : vector<8x32xf32>
    %50 = tpu.matmul %48, %49, %cst_24 {dimension_numbers = #tpu.dot_dimension_numbers<[1], [0], [0], [1], [0, 0, 1, 1], [], []>} : vector<8x32xbf16>, vector<32x32xbf16>, vector<8x32xf32> -> vector<8x32xf32>
    %c0_25 = arith.constant 0 : index
    %c0_26 = arith.constant 0 : index
    %c0_27 = arith.constant 0 : index
    %51 = vector.load %arg4[%c0_25, %c0_26, %c0_27] : memref<8x8x32xf32, #tpu.memory_space<vmem>>, vector<8x8x32xf32>
    %52 = vector.shape_cast %50 : vector<8x32xf32> to vector<8x1x32xf32>
    %53 = vector.broadcast %52 : vector<8x1x32xf32> to vector<8x8x32xf32>
    %54 = arith.mulf %51, %53 : vector<8x8x32xf32>
    %cst_28 = arith.constant dense<0.000000e+00> : vector<8x8xf32>
    %55 = vector.multi_reduction <add>, %54, %cst_28 [2] : vector<8x8x32xf32> to vector<8x8xf32>
    %cst_29 = arith.constant dense<0xFF800000> : vector<8xf32>
    %56 = vector.multi_reduction <maximumf>, %55, %cst_29 [1] : vector<8x8xf32> to vector<8xf32>
    %57 = vector.shape_cast %56 : vector<8xf32> to vector<8x1xf32>
    %58 = vector.broadcast %57 : vector<8x1xf32> to vector<8x8xf32>
    %59 = arith.subf %55, %58 : vector<8x8xf32>
    %60 = math.exp %59 : vector<8x8xf32>
    %cst_30 = arith.constant dense<0.000000e+00> : vector<8xf32>
    %61 = vector.multi_reduction <add>, %60, %cst_30 [1] : vector<8x8xf32> to vector<8xf32>
    %62 = vector.shape_cast %61 : vector<8xf32> to vector<8x1xf32>
    %63 = vector.broadcast %62 : vector<8x1xf32> to vector<8x8xf32>
    %64 = arith.divf %60, %63 : vector<8x8xf32>
    %65 = vector.shape_cast %64 : vector<8x8xf32> to vector<8x8x1xf32>
    %66 = vector.broadcast %65 : vector<8x8x1xf32> to vector<8x8x32xf32>
    %67 = arith.mulf %66, %51 : vector<8x8x32xf32>
    %cst_31 = arith.constant dense<0.000000e+00> : vector<8x32xf32>
    %68 = vector.multi_reduction <add>, %67, %cst_31 [1] : vector<8x8x32xf32> to vector<8x32xf32>
    %69 = arith.truncf %68 : vector<8x32xf32> to vector<8x32xbf16>
    %c0_32 = arith.constant 0 : index
    %c0_33 = arith.constant 0 : index
    %70 = vector.load %arg11[%c0_32, %c0_33] : memref<32x64xbf16, #tpu.memory_space<vmem>>, vector<32x64xbf16>
    %cst_34 = arith.constant dense<0.000000e+00> : vector<8x64xf32>
    %71 = tpu.matmul %69, %70, %cst_34 {dimension_numbers = #tpu.dot_dimension_numbers<[1], [0], [0], [1], [0, 0, 1, 1], [], []>} : vector<8x32xbf16>, vector<32x64xbf16>, vector<8x64xf32> -> vector<8x64xf32>
    %72 = arith.truncf %47 : vector<8x32xf32> to vector<8x32xbf16>
    %c0_35 = arith.constant 0 : index
    %c0_36 = arith.constant 0 : index
    %73 = vector.load %arg12[%c0_35, %c0_36] : memref<32x64xbf16, #tpu.memory_space<vmem>>, vector<32x64xbf16>
    %cst_37 = arith.constant dense<0.000000e+00> : vector<8x64xf32>
    %74 = tpu.matmul %72, %73, %cst_37 {dimension_numbers = #tpu.dot_dimension_numbers<[1], [0], [0], [1], [0, 0, 1, 1], [], []>} : vector<8x32xbf16>, vector<32x64xbf16>, vector<8x64xf32> -> vector<8x64xf32>
    %75 = arith.addf %71, %74 : vector<8x64xf32>
    %c0_38 = arith.constant 0 : index
    %c0_39 = arith.constant 0 : index
    %76 = vector.load %arg13[%c0_38, %c0_39] : memref<1x64xf32, #tpu.memory_space<vmem>>, vector<1x64xf32>
    %77 = vector.broadcast %76 : vector<1x64xf32> to vector<8x64xf32>
    %78 = arith.addf %75, %77 : vector<8x64xf32>
    %79 = math.tanh %78 : vector<8x64xf32>
    %80 = arith.truncf %79 : vector<8x64xf32> to vector<8x64xbf16>
    %c0_40 = arith.constant 0 : index
    %c0_41 = arith.constant 0 : index
    %81 = vector.load %arg14[%c0_40, %c0_41] : memref<64x128xbf16, #tpu.memory_space<vmem>>, vector<64x128xbf16>
    %cst_42 = arith.constant dense<0.000000e+00> : vector<8x128xf32>
    %82 = tpu.matmul %80, %81, %cst_42 {dimension_numbers = #tpu.dot_dimension_numbers<[1], [0], [0], [1], [0, 0, 1, 1], [], []>} : vector<8x64xbf16>, vector<64x128xbf16>, vector<8x128xf32> -> vector<8x128xf32>
    %c0_43 = arith.constant 0 : index
    %c0_44 = arith.constant 0 : index
    %83 = vector.load %arg15[%c0_43, %c0_44] : memref<1x128xf32, #tpu.memory_space<vmem>>, vector<1x128xf32>
    %84 = vector.broadcast %83 : vector<1x128xf32> to vector<8x128xf32>
    %85 = arith.addf %82, %84 : vector<8x128xf32>
    %cst_45 = arith.constant dense<0xFF800000> : vector<8xf32>
    %86 = vector.multi_reduction <maximumf>, %85, %cst_45 [1] : vector<8x128xf32> to vector<8xf32>
    %87 = vector.shape_cast %86 : vector<8xf32> to vector<8x1xf32>
    %88 = vector.broadcast %87 : vector<8x1xf32> to vector<8x128xf32>
    %89 = arith.subf %85, %88 : vector<8x128xf32>
    %90 = math.exp %89 : vector<8x128xf32>
    %cst_46 = arith.constant dense<0.000000e+00> : vector<8xf32>
    %91 = vector.multi_reduction <add>, %90, %cst_46 [1] : vector<8x128xf32> to vector<8xf32>
    %92 = vector.shape_cast %91 : vector<8xf32> to vector<8x1xf32>
    %93 = math.log %92 : vector<8x1xf32>
    %94 = arith.addf %87, %93 : vector<8x1xf32>
    %95 = vector.broadcast %94 : vector<8x1xf32> to vector<8x128xf32>
    %96 = arith.subf %85, %95 : vector<8x128xf32>
    %c0_47 = arith.constant 0 : index
    %c0_48 = arith.constant 0 : index
    %c0_49 = arith.constant 0 : index
    %97 = vector.load %arg16[%c0_47, %c0_48, %c0_49] : memref<1x8x128xf32, #tpu.memory_space<vmem>>, vector<1x8x128xf32>
    %98 = vector.shape_cast %97 : vector<1x8x128xf32> to vector<8x128xf32>
    %99 = vector.shape_cast %96 : vector<8x128xf32> to vector<1x8x128xf32>
    tpu.vector_store %arg16[%c0_47, %c0_48, %c0_49], %99 {strides = array<i32>} : memref<1x8x128xf32, #tpu.memory_space<vmem>>, vector<1x8x128xf32>,
    %c0_50 = arith.constant 0 : index
    %c0_51 = arith.constant 0 : index
    %c0_52 = arith.constant 0 : index
    %100 = vector.load %arg17[%c0_50, %c0_51, %c0_52] : memref<1x8x8xf32, #tpu.memory_space<vmem>>, vector<1x8x8xf32>
    %101 = vector.shape_cast %100 : vector<1x8x8xf32> to vector<8x8xf32>
    %102 = vector.shape_cast %64 : vector<8x8xf32> to vector<1x8x8xf32>
    tpu.vector_store %arg17[%c0_50, %c0_51, %c0_52], %102 {strides = array<i32>} : memref<1x8x8xf32, #tpu.memory_space<vmem>>, vector<1x8x8xf32>,
    %c0_53 = arith.constant 0 : index
    %c0_54 = arith.constant 0 : index
    %103 = vector.load %arg20[%c0_53, %c0_54] : memref<8x32xf32, #tpu.memory_space<vmem>>, vector<8x32xf32>
    tpu.vector_store %arg20[%c0_53, %c0_54], %47 {strides = array<i32>} : memref<8x32xf32, #tpu.memory_space<vmem>>, vector<8x32xf32>,
    %c0_55 = arith.constant 0 : index
    %c0_56 = arith.constant 0 : index
    %104 = vector.load %arg21[%c0_55, %c0_56] : memref<8x32xf32, #tpu.memory_space<vmem>>, vector<8x32xf32>
    tpu.vector_store %arg21[%c0_55, %c0_56], %68 {strides = array<i32>} : memref<8x32xf32, #tpu.memory_space<vmem>>, vector<8x32xf32>,
    %c3_i32 = arith.constant 3 : i32
    %105 = arith.cmpi eq, %arg0, %c3_i32 : i32
    %106 = arith.extui %105 : i1 to i32
    %c0_i32_57 = arith.constant 0 : i32
    %107 = arith.cmpi ne, %106, %c0_i32_57 : i32
    scf.if %107 {
      %c0_58 = arith.constant 0 : index
      %c0_59 = arith.constant 0 : index
      %108 = vector.load %arg18[%c0_58, %c0_59] : memref<8x32xf32, #tpu.memory_space<vmem>>, vector<8x32xf32>
      tpu.vector_store %arg18[%c0_58, %c0_59], %47 {strides = array<i32>} : memref<8x32xf32, #tpu.memory_space<vmem>>, vector<8x32xf32>,
      %c0_60 = arith.constant 0 : index
      %c0_61 = arith.constant 0 : index
      %109 = vector.load %arg19[%c0_60, %c0_61] : memref<8x32xf32, #tpu.memory_space<vmem>>, vector<8x32xf32>
      tpu.vector_store %arg19[%c0_60, %c0_61], %68 {strides = array<i32>} : memref<8x32xf32, #tpu.memory_space<vmem>>, vector<8x32xf32>,
    } else {
    }
    return
  }
  func.func @transform_0(%arg0: i32) -> (i32, i32, i32) {
    %c0_i32 = arith.constant 0 : i32
    %c0_i32_0 = arith.constant 0 : i32
    %c0_i32_1 = arith.constant 0 : i32
    return %arg0, %c0_i32, %c0_i32_0 : i32, i32, i32
  }
  func.func @transform_1(%arg0: i32) -> (i32, i32) {
    %c0_i32 = arith.constant 0 : i32
    %c0_i32_0 = arith.constant 0 : i32
    %c0_i32_1 = arith.constant 0 : i32
    return %c0_i32, %c0_i32_0 : i32, i32
  }
  func.func @transform_2(%arg0: i32) -> (i32, i32) {
    %c0_i32 = arith.constant 0 : i32
    %c0_i32_0 = arith.constant 0 : i32
    %c0_i32_1 = arith.constant 0 : i32
    return %c0_i32, %c0_i32_0 : i32, i32
  }
  func.func @transform_3(%arg0: i32) -> (i32, i32, i32) {
    %c0_i32 = arith.constant 0 : i32
    %c0_i32_0 = arith.constant 0 : i32
    %c0_i32_1 = arith.constant 0 : i32
    %c0_i32_2 = arith.constant 0 : i32
    return %c0_i32, %c0_i32_0, %c0_i32_1 : i32, i32, i32
  }
  func.func @transform_4(%arg0: i32) -> (i32, i32) {
    %c0_i32 = arith.constant 0 : i32
    %c0_i32_0 = arith.constant 0 : i32
    %c0_i32_1 = arith.constant 0 : i32
    return %c0_i32, %c0_i32_0 : i32, i32
  }
  func.func @transform_5(%arg0: i32) -> (i32, i32) {
    %c0_i32 = arith.constant 0 : i32
    %c0_i32_0 = arith.constant 0 : i32
    %c0_i32_1 = arith.constant 0 : i32
    return %c0_i32, %c0_i32_0 : i32, i32
  }
  func.func @transform_6(%arg0: i32) -> (i32, i32) {
    %c0_i32 = arith.constant 0 : i32
    %c0_i32_0 = arith.constant 0 : i32
    %c0_i32_1 = arith.constant 0 : i32
    return %c0_i32, %c0_i32_0 : i32, i32
  }
  func.func @transform_7(%arg0: i32) -> (i32, i32) {
    %c0_i32 = arith.constant 0 : i32
    %c0_i32_0 = arith.constant 0 : i32
    %c0_i32_1 = arith.constant 0 : i32
    return %c0_i32, %c0_i32_0 : i32, i32
  }
  func.func @transform_8(%arg0: i32) -> (i32, i32) {
    %c0_i32 = arith.constant 0 : i32
    %c0_i32_0 = arith.constant 0 : i32
    %c0_i32_1 = arith.constant 0 : i32
    return %c0_i32, %c0_i32_0 : i32, i32
  }
  func.func @transform_9(%arg0: i32) -> (i32, i32) {
    %c0_i32 = arith.constant 0 : i32
    %c0_i32_0 = arith.constant 0 : i32
    %c0_i32_1 = arith.constant 0 : i32
    return %c0_i32, %c0_i32_0 : i32, i32
  }
  func.func @transform_10(%arg0: i32) -> (i32, i32) {
    %c0_i32 = arith.constant 0 : i32
    %c0_i32_0 = arith.constant 0 : i32
    %c0_i32_1 = arith.constant 0 : i32
    return %c0_i32, %c0_i32_0 : i32, i32
  }
  func.func @transform_11(%arg0: i32) -> (i32, i32) {
    %c0_i32 = arith.constant 0 : i32
    %c0_i32_0 = arith.constant 0 : i32
    %c0_i32_1 = arith.constant 0 : i32
    return %c0_i32, %c0_i32_0 : i32, i32
  }
  func.func @transform_12(%arg0: i32) -> (i32, i32) {
    %c0_i32 = arith.constant 0 : i32
    %c0_i32_0 = arith.constant 0 : i32
    %c0_i32_1 = arith.constant 0 : i32
    return %c0_i32, %c0_i32_0 : i32, i32
  }
  func.func @transform_13(%arg0: i32) -> (i32, i32) {
    %c0_i32 = arith.constant 0 : i32
    %c0_i32_0 = arith.constant 0 : i32
    %c0_i32_1 = arith.constant 0 : i32
    return %c0_i32, %c0_i32_0 : i32, i32
  }
  func.func @transform_14(%arg0: i32) -> (i32, i32) {
    %c0_i32 = arith.constant 0 : i32
    %c0_i32_0 = arith.constant 0 : i32
    %c0_i32_1 = arith.constant 0 : i32
    return %c0_i32, %c0_i32_0 : i32, i32
  }
  func.func @transform_15(%arg0: i32) -> (i32, i32, i32) {
    %c0_i32 = arith.constant 0 : i32
    %c0_i32_0 = arith.constant 0 : i32
    %c0_i32_1 = arith.constant 0 : i32
    return %arg0, %c0_i32, %c0_i32_0 : i32, i32, i32
  }
  func.func @transform_16(%arg0: i32) -> (i32, i32, i32) {
    %c0_i32 = arith.constant 0 : i32
    %c0_i32_0 = arith.constant 0 : i32
    %c0_i32_1 = arith.constant 0 : i32
    return %arg0, %c0_i32, %c0_i32_0 : i32, i32, i32
  }
  func.func @transform_17(%arg0: i32) -> (i32, i32) {
    %c0_i32 = arith.constant 0 : i32
    %c0_i32_0 = arith.constant 0 : i32
    %c0_i32_1 = arith.constant 0 : i32
    return %c0_i32, %c0_i32_0 : i32, i32
  }
  func.func @transform_18(%arg0: i32) -> (i32, i32) {
    %c0_i32 = arith.constant 0 : i32
    %c0_i32_0 = arith.constant 0 : i32
    %c0_i32_1 = arith.constant 0 : i32
    return %c0_i32, %c0_i32_0 : i32, i32
  }
}

</mosaic_0001>

<bundles_post_ra>
// kernel: tpu_custom_call.1
= control target key start
LH: loop header
LB: loop body
LE: loop exit
PB: predicated region body
PF: predicated region fallthrough
CT: control target
= control target key end

     0   :  { %s3900_s0 = inlined_call_operand.hbm [shape: bf16[4,8,32], index: 0, kind: input, shape index: {}]   ;;  %s3901_s1 = inlined_call_operand.hbm [shape: f32[8,32], index: 1, kind: input, shape index: {}]   ;;  %s3902_s2 = inlined_call_operand.hbm [shape: f32[8,32], index: 2, kind: input, shape index: {}]   ;;  %s3903_s3 = inlined_call_operand.hbm [shape: f32[8,8,32], index: 3, kind: input, shape index: {}]   ;;  %s3904_s4 = inlined_call_operand.hbm [shape: bf16[32,32], index: 4, kind: input, shape index: {}]   ;;  %s3905_s5 = inlined_call_operand.vmem [shape: bf16[32,96], index: 5, kind: input, shape index: {}]   ;;  %s3906_s6 = inlined_call_operand.hbm [shape: bf16[32,96], index: 6, kind: input, shape index: {}]   ;;  %s3907_s7 = inlined_call_operand.hbm [shape: bf16[32,96], index: 7, kind: input, shape index: {}]   ;;  %s3908_s8 = inlined_call_operand.vmem [shape: f32[1,96], index: 8, kind: input, shape index: {}]   ;;  %s3909_s9 = inlined_call_operand.hbm [shape: f32[1,96], index: 9, kind: input, shape index: {}]   ;;  %s3910_s10 = inlined_call_operand.hbm [shape: bf16[32,64], index: 10, kind: input, shape index: {}]   ;;  %s3911_s11 = inlined_call_operand.hbm [shape: bf16[32,64], index: 11, kind: input, shape index: {}]   ;;  %s3912_s12 = inlined_call_operand.hbm [shape: f32[1,64], index: 12, kind: input, shape index: {}]   ;;  %s3913_s13 = inlined_call_operand.vmem [shape: bf16[64,128], index: 13, kind: input, shape index: {}]   ;;  %s3914_s14 = inlined_call_operand.vmem [shape: f32[1,128], index: 14, kind: input, shape index: {}]   ;;  %s3915_s15 = inlined_call_operand.hbm [shape: f32[4,8,128], index: 15, kind: output, shape index: {0}]   ;;  %s3916_s16 = inlined_call_operand.hbm [shape: f32[4,8,8], index: 16, kind: output, shape index: {1}]   ;;  %s3917_s17 = inlined_call_operand.hbm [shape: f32[8,32], index: 17, kind: output, shape index: {2}]   ;;  %s3918_s18 = inlined_call_operand.hbm [shape: f32[8,32], index: 18, kind: output, shape index: {3}]  }
   0x1   :  { %3935 = sst [smem:[#allocation38_spill]] %s3900_s0 }
   0x2   :  { %3936 = sst [smem:[#allocation39_spill]] %s3901_s1 }
   0x3   :  { %3937 = sst [smem:[#allocation40_spill]] %s3902_s2 }
   0x4   :  { %3938 = sst [smem:[#allocation41_spill]] %s3903_s3 }
   0x5   :  { %3939 = sst [smem:[#allocation42_spill]] %s3904_s4 }
   0x6   :  { %3940 = sst [smem:[#allocation43_spill]] %s3905_s5 }
   0x7   :  { %3941 = sst [smem:[#allocation44_spill]] %s3906_s6 }
   0x8   :  { %3942 = sst [smem:[#allocation45_spill]] %s3907_s7 }
   0x9   :  { %3943 = sst [smem:[#allocation46_spill]] %s3908_s8 }
   0xa   :  { %3944 = sst [smem:[#allocation47_spill]] %s3909_s9 }
   0xb   :  { %3945 = sst [smem:[#allocation48_spill]] %s3913_s13 }
   0xc   :  { %3946 = sst [smem:[#allocation49_spill]] %s3914_s14 }
   0xd   :  { %3947 = sst [smem:[#allocation50_spill]] %s3915_s15 }
   0xe   :  { %3948 = sst [smem:[#allocation51_spill]] %s3916_s16 }
   0xf   :  { %3949 = sst [smem:[#allocation52_spill]] %s3917_s17 }
  0x10   :  { %3950 = sst [smem:[#allocation53_spill]] %s3918_s18 }
  0x11   :  { %24 = vsyncpa [#allocation5], 0 }
  0x12   :  { %26 = vsyncpa [#allocation5 + $0x1], 0 }
  0x13   :  { %27 = vsyncpa [#allocation8], 0 }
  0x14   :  { %28 = vsyncpa [#allocation11], 0 }
  0x15   :  { %29 = vsyncpa [#allocation14], 0 }
  0x16   :  { %30 = vsyncpa [#allocation17], 0 }
  0x17   :  { %31 = vsyncpa [#allocation20], 0 }
  0x18   :  { %32 = vsyncpa [#allocation6], 0 }
  0x19   :  { %34 = vsyncpa [#allocation6 + $0x1], 0 }
  0x1a   :  { %35 = vsyncpa [#allocation24], 0 }
  0x1b   :  { %37 = vsyncpa [#allocation24 + $0x1], 0 }
  0x1c   :  { %38 = vsyncpa [#allocation27], 0  ;;  %s3122_s27 = smov 0   ;;  %s3124_s28 = smov 0  }
  0x1d   :  { %s3126_s29 = smov 0   ;;  %s3128_s30 = smov 0  }
  0x1e LB: > { %s3001_s0 = smov [#allocation7]   ;;  %s3143_s1 = sadd.s32 4294967295, %s2999_s30   ;;  %s2999_s30 = sphi %s3128_s30, %s4004_s30   ;;  %s2995_s29 = sphi %s3126_s29, %s4003_s29   ;;  %s2991_s28 = sphi %s3124_s28, %s4002_s28   ;;  %s2987_s27 = sphi %s3122_s27, %s4001_s27  }
  0x1f   : > { %s476_s19 = sshll.u32 %s3001_s0, 4  ;;  %p2121_p0 = scmp.ge.s32.totalorder %s2999_s30, 1  ;;  %s477_s19 = int_to_ptr.vmem [resolvable:$true] %s476_s19 }
  0x20   : > { %p3926_p1 = scmp.eq.s32.totalorder %s3143_s1, 0  ;;  %p463_p2 = scmp.lt.s32.totalorder %s2999_s30, 5 }
  0x21   : > { %s3002_s21 = smov [#allocation10]   ;;  %s3003_s23 = smov [#allocation13]  }
  0x22   : > { %p3149_p4 = pnand %p2121_p0, %p463_p2  ;;  %s497_s22 = sshll.u32 %s3002_s21, 4  ;;  %s3155_s22 = int_to_ptr.vmem [resolvable:$true] %s497_s22 }
  0x23   : > { %s3163_s24 = sshll.u32 %s3003_s23, 4  ;;  %s3953_s0 = sld [smem:[#allocation39_spill]]  ;;  %s527_s24 = int_to_ptr.vmem [resolvable:$true] %s3163_s24 }
  0x24   : > { %s3951_s20 = scalar_select %p3149_p4, 1, 0 }
  0x25   : > { %p2326_p5 = pneg %p3149_p4 }
  0x27   : > { %p3159_p6 = pnand %p2326_p5, %p3926_p1 }
  0x29   : > { %s2511_s18 = scalar_lea.hbm %s3953_s0, 128  ;;  %p3173_p8 = pneg %p3159_p6 }
  0x2a   : > { %p2512_p7 = scmp.ne.s32.totalorder %s3953_s0, %s2511_s18  ;;  %p2518_p11 = scmp.lt.u32.totalorder %s2511_s18, %s3953_s0 }
  0x2c   : > { %p2514_p9 = pnand %p3173_p8, %p2512_p7 }
  0x2e   : > { %p2515_p10 = pneg %p2514_p9 }
  0x30   : > { %p2520_p12 = pnand %p2518_p11, %p2515_p10 }
  0x32   : > { %2523 = shalt.err (!%p2520_p12)
}
  0x33   : > { %s2524_s25 = scalar_lea.vmem %s477_s19, 128  ;;  %p2532_p5 = scmp.lt.s32.totalorder %s477_s19, %s477_s19 }
  0x34   : > { %p2525_p13 = scmp.ne.s32.totalorder %s477_s19, %s2524_s25  ;;  %p2533_p3 = scmp.lt.s32.totalorder %s2524_s25, %s2524_s25 }
  0x36   : > { %p2527_p0 = pnand %p2525_p13, %p3173_p8  ;;  %p2534_p1 = por %p2533_p3, %p2532_p5 }
  0x38   : > { %p2528_p2 = pneg %p2527_p0 }
  0x3a   : > { %p2535_p4 = pnand %p2534_p1, %p2528_p2 }
  0x3c   : > { %2538 = shalt.err (!%p2535_p4)
}
  0x3d   : > { %2329 = dma.hbm_to_vmem [thread:$0]  (!%p3159_p6), %s3953_s0, 128, %s477_s19, [#allocation8]  }
  0x3e   : > { %s3955_s3 = sld [smem:[#allocation41_spill]] }
  0x44   : > { %s2539_s26 = scalar_lea.hbm %s3955_s3, 1024 }
  0x45   : > { %p2540_p7 = scmp.ne.s32.totalorder %s3955_s3, %s2539_s26  ;;  %p2546_p1 = scmp.lt.u32.totalorder %s2539_s26, %s3955_s3 }
  0x47   : > { %p2542_p9 = pnand %p2540_p7, %p3173_p8 }
  0x49   : > { %p2543_p3 = pneg %p2542_p9 }
  0x4b   : > { %p2548_p4 = pnand %p2546_p1, %p2543_p3 }
  0x4d   : > { %2551 = shalt.err (!%p2548_p4)
}
  0x4e   : > { %s2552_s19 = scalar_lea.vmem %s3155_s22, 1024  ;;  %p2560_p13 = scmp.lt.s32.totalorder %s3155_s22, %s3155_s22 }
  0x4f   : > { %p2553_p10 = scmp.ne.s32.totalorder %s3155_s22, %s2552_s19  ;;  %p2561_p0 = scmp.lt.s32.totalorder %s2552_s19, %s2552_s19 }
  0x51   : > { %p2555_p11 = pnand %p2553_p10, %p3173_p8  ;;  %p2562_p2 = por %p2561_p0, %p2560_p13 }
  0x53   : > { %p2556_p12 = pneg %p2555_p11 }
  0x55   : > { %p2563_p5 = pnand %p2562_p2, %p2556_p12 }
  0x57   : > { %2566 = shalt.err (!%p2563_p5)
}
  0x58   : > { %s3004_s14 = smov 128   ;;  %s3005_s13 = smov 8  }
  0x59   : > { %2335 = dma.hbm_to_vmem [thread:$0]  (!%p3159_p6), %s3955_s3, 1024, %s3155_s22, [#allocation11], %s3004_s14, %s3004_s14, %s3005_s13  }
  0x5a   : > { %s3956_s6 = sld [smem:[#allocation44_spill]] }
  0x60   : > { %s2567_s26 = scalar_lea.hbm %s3956_s6, 256 }
  0x61   : > { %p2568_p7 = scmp.ne.s32.totalorder %s3956_s6, %s2567_s26  ;;  %p2574_p1 = scmp.lt.u32.totalorder %s2567_s26, %s3956_s6 }
  0x63   : > { %p2570_p9 = pnand %p2568_p7, %p3173_p8 }
  0x65   : > { %p2571_p3 = pneg %p2570_p9 }
  0x67   : > { %p2576_p4 = pnand %p2574_p1, %p2571_p3 }
  0x69   : > { %2579 = shalt.err (!%p2576_p4)
}
  0x6a   : > { %s2580_s15 = scalar_lea.vmem %s527_s24, 256  ;;  %p2588_p13 = scmp.lt.s32.totalorder %s527_s24, %s527_s24 }
  0x6b   : > { %p2581_p10 = scmp.ne.s32.totalorder %s527_s24, %s2580_s15  ;;  %p2589_p0 = scmp.lt.s32.totalorder %s2580_s15, %s2580_s15 }
  0x6d   : > { %p2583_p11 = pnand %p2581_p10, %p3173_p8  ;;  %p2590_p2 = por %p2589_p0, %p2588_p13 }
  0x6f   : > { %p2584_p12 = pneg %p2583_p11 }
  0x71   : > { %p2591_p5 = pnand %p2590_p2, %p2584_p12 }
  0x73   : > { %2594 = shalt.err (!%p2591_p5)
}
  0x74   : > { %s3006_s22 = smov 64   ;;  %s3007_s14 = smov 4  }
  0x75   : > { %2341 = dma.hbm_to_vmem [thread:$0]  (!%p3159_p6), %s3956_s6, 256, %s527_s24, [#allocation14], %s3006_s22, %s3006_s22, %s3007_s14  }
  0x76   : > { %s3008_s17 = smov [#allocation16]   ;;  %s3009_s18 = smov [#allocation19]  }
  0x77   : > { %s556_s16 = sshll.u32 %s3008_s17, 4  ;;  %s579_s26 = sshll.u32 %s3009_s18, 4  ;;  %s557_s16 = int_to_ptr.vmem [resolvable:$true] %s556_s16  ;;  %s580_s26 = int_to_ptr.vmem [resolvable:$true] %s579_s26 }
  0x78   : > { %s3957_s9 = sld [smem:[#allocation47_spill]] }
  0x7e   : > { %s2595_s19 = scalar_lea.hbm %s3957_s9, 16 }
  0x7f   : > { %p2596_p7 = scmp.ne.s32.totalorder %s3957_s9, %s2595_s19  ;;  %p2602_p1 = scmp.lt.u32.totalorder %s2595_s19, %s3957_s9 }
  0x81   : > { %p2598_p9 = pnand %p2596_p7, %p3173_p8 }
  0x83   : > { %p2599_p3 = pneg %p2598_p9 }
  0x85   : > { %p2604_p4 = pnand %p2602_p1, %p2599_p3 }
  0x87   : > { %2607 = shalt.err (!%p2604_p4)
}
  0x88   : > { %s2608_s24 = scalar_lea.vmem %s557_s16, 16  ;;  %s2615_s0 = scalar_lea.vmem %s557_s16, 32 }
  0x89   : > { %p2609_p10 = scmp.ne.s32.totalorder %s557_s16, %s2608_s24  ;;  %p2616_p13 = scmp.lt.s32.totalorder %s557_s16, %s557_s16 }
  0x8a   : > { %p2617_p0 = scmp.lt.s32.totalorder %s2615_s0, %s2608_s24 }
  0x8b   : > { %p2611_p11 = pnand %p2609_p10, %p3173_p8 }
  0x8c   : > { %p2618_p2 = por %p2617_p0, %p2616_p13 }
  0x8d   : > { %p2612_p12 = pneg %p2611_p11 }
  0x8f   : > { %p2619_p5 = pnand %p2618_p2, %p2612_p12 }
  0x91   : > { %2622 = shalt.err (!%p2619_p5)
}
  0x92   : > { %2347 = dma.hbm_to_vmem [thread:$0]  (!%p3159_p6), %s3957_s9, 16, %s557_s16, [#allocation17]  }
  0x93   : > { %s2623_s17 = scalar_lea.hbm %s3911_s11, 256 }
  0x94   : > { %p2624_p7 = scmp.ne.s32.totalorder %s3911_s11, %s2623_s17  ;;  %p2630_p1 = scmp.lt.u32.totalorder %s2623_s17, %s3911_s11 }
  0x96   : > { %p2626_p9 = pnand %p2624_p7, %p3173_p8 }
  0x98   : > { %p2627_p3 = pneg %p2626_p9 }
  0x9a   : > { %p2632_p4 = pnand %p2630_p1, %p2627_p3 }
  0x9c   : > { %2635 = shalt.err (!%p2632_p4)
}
  0x9d   : > { %s2636_s15 = scalar_lea.vmem %s580_s26, 256  ;;  %p2644_p13 = scmp.lt.s32.totalorder %s580_s26, %s580_s26 }
  0x9e   : > { %p2637_p10 = scmp.ne.s32.totalorder %s580_s26, %s2636_s15  ;;  %p2645_p0 = scmp.lt.s32.totalorder %s2636_s15, %s2636_s15 }
  0xa0   : > { %p2639_p11 = pnand %p2637_p10, %p3173_p8  ;;  %p2646_p2 = por %p2645_p0, %p2644_p13 }
  0xa2   : > { %p2640_p12 = pneg %p2639_p11 }
  0xa4   : > { %p2647_p5 = pnand %p2646_p2, %p2640_p12 }
  0xa6   : > { %2650 = shalt.err (!%p2647_p5)
}
  0xa7   : > { %2353 = dma.hbm_to_vmem [thread:$0]  (!%p3159_p6), %s3911_s11, 256, %s580_s26, [#allocation20], %s3006_s22, %s3006_s22, %s3007_s14  }
  0xa8   : > { %s3010_s0 = smov [#allocation9]   ;;  %s3011_s13 = smov [#allocation12]  }
  0xa9   : > { %s487_s3 = sshll.u32 %s3010_s0, 4  ;;  %s510_s5 = sshll.u32 %s3011_s13, 4  ;;  %s488_s3 = int_to_ptr.vmem [resolvable:$true] %s487_s3  ;;  %s511_s5 = int_to_ptr.vmem [resolvable:$true] %s510_s5 }
  0xaa   : > { %s3958_s18 = sld [smem:[#allocation40_spill]] }
  0xb0   : > { %s2651_s23 = scalar_lea.hbm %s3958_s18, 128 }
  0xb1   : > { %p2652_p7 = scmp.ne.s32.totalorder %s3958_s18, %s2651_s23  ;;  %p2658_p1 = scmp.lt.u32.totalorder %s2651_s23, %s3958_s18 }
  0xb3   : > { %p2654_p9 = pnand %p2652_p7, %p3173_p8 }
  0xb5   : > { %p2655_p3 = pneg %p2654_p9 }
  0xb7   : > { %p2660_p4 = pnand %p2658_p1, %p2655_p3 }
  0xb9   : > { %2663 = shalt.err (!%p2660_p4)
}
  0xba   : > { %s2664_s26 = scalar_lea.vmem %s488_s3, 128  ;;  %p2672_p13 = scmp.lt.s32.totalorder %s488_s3, %s488_s3 }
  0xbb   : > { %p2665_p10 = scmp.ne.s32.totalorder %s488_s3, %s2664_s26  ;;  %p2673_p0 = scmp.lt.s32.totalorder %s2664_s26, %s2664_s26 }
  0xbd   : > { %p2667_p11 = pnand %p2665_p10, %p3173_p8  ;;  %p2674_p2 = por %p2673_p0, %p2672_p13 }
  0xbf   : > { %p2668_p12 = pneg %p2667_p11 }
  0xc1   : > { %p2675_p5 = pnand %p2674_p2, %p2668_p12 }
  0xc3   : > { %2678 = shalt.err (!%p2675_p5)
}
  0xc4   : > { %2332 = dma.hbm_to_vmem [thread:$0]  (!%p3159_p6), %s3958_s18, 128, %s488_s3, [#allocation8]  }
  0xc5   : > { %s3959_s4 = sld [smem:[#allocation42_spill]] }
  0xcb   : > { %s2679_s17 = scalar_lea.hbm %s3959_s4, 256 }
  0xcc   : > { %p2680_p7 = scmp.ne.s32.totalorder %s3959_s4, %s2679_s17  ;;  %p2686_p1 = scmp.lt.u32.totalorder %s2679_s17, %s3959_s4 }
  0xce   : > { %p2682_p9 = pnand %p2680_p7, %p3173_p8 }
  0xd0   : > { %p2683_p3 = pneg %p2682_p9 }
  0xd2   : > { %p2688_p4 = pnand %p2686_p1, %p2683_p3 }
  0xd4   : > { %2691 = shalt.err (!%p2688_p4)
}
  0xd5   : > { %s2692_s16 = scalar_lea.vmem %s511_s5, 256  ;;  %p2700_p13 = scmp.lt.s32.totalorder %s511_s5, %s511_s5 }
  0xd6   : > { %p2693_p10 = scmp.ne.s32.totalorder %s511_s5, %s2692_s16  ;;  %p2701_p0 = scmp.lt.s32.totalorder %s2692_s16, %s2692_s16 }
  0xd8   : > { %p2695_p11 = pnand %p2693_p10, %p3173_p8  ;;  %p2702_p2 = por %p2701_p0, %p2700_p13 }
  0xda   : > { %p2696_p12 = pneg %p2695_p11 }
  0xdc   : > { %p2703_p5 = pnand %p2702_p2, %p2696_p12 }
  0xde   : > { %2706 = shalt.err (!%p2703_p5)
}
  0xdf   : > { %2338 = dma.hbm_to_vmem [thread:$0]  (!%p3159_p6), %s3959_s4, 256, %s511_s5, [#allocation11], %s3006_s22, %s3006_s22, %s3007_s14  }
  0xe0   : > { %s3012_s24 = smov [#allocation15]   ;;  %s3013_s13 = smov [#allocation18]  }
  0xe1   : > { %s539_s0 = sshll.u32 %s3012_s24, 4  ;;  %s566_s8 = sshll.u32 %s3013_s13, 4  ;;  %s540_s0 = int_to_ptr.vmem [resolvable:$true] %s539_s0  ;;  %s567_s8 = int_to_ptr.vmem [resolvable:$true] %s566_s8 }
  0xe2   : > { %s3960_s7 = sld [smem:[#allocation45_spill]] }
  0xe8   : > { %s2707_s25 = scalar_lea.hbm %s3960_s7, 256 }
  0xe9   : > { %p2708_p7 = scmp.ne.s32.totalorder %s3960_s7, %s2707_s25  ;;  %p2714_p1 = scmp.lt.u32.totalorder %s2707_s25, %s3960_s7 }
  0xeb   : > { %p2710_p9 = pnand %p2708_p7, %p3173_p8 }
  0xed   : > { %p2711_p3 = pneg %p2710_p9 }
  0xef   : > { %p2716_p4 = pnand %p2714_p1, %p2711_p3 }
  0xf1   : > { %2719 = shalt.err (!%p2716_p4)
}
  0xf2   : > { %s2720_s5 = scalar_lea.vmem %s540_s0, 256  ;;  %p2728_p13 = scmp.lt.s32.totalorder %s540_s0, %s540_s0 }
  0xf3   : > { %p2721_p10 = scmp.ne.s32.totalorder %s540_s0, %s2720_s5  ;;  %p2729_p0 = scmp.lt.s32.totalorder %s2720_s5, %s2720_s5 }
  0xf5   : > { %p2723_p11 = pnand %p2721_p10, %p3173_p8  ;;  %p2730_p2 = por %p2729_p0, %p2728_p13 }
  0xf7   : > { %p2724_p12 = pneg %p2723_p11 }
  0xf9   : > { %p2731_p5 = pnand %p2730_p2, %p2724_p12 }
  0xfb   : > { %2734 = shalt.err (!%p2731_p5)
}
  0xfc   : > { %2344 = dma.hbm_to_vmem [thread:$0]  (!%p3159_p6), %s3960_s7, 256, %s540_s0, [#allocation14], %s3006_s22, %s3006_s22, %s3007_s14  }
  0xfd   : > { %s2735_s23 = scalar_lea.hbm %s3910_s10, 256 }
  0xfe   : > { %p2736_p7 = scmp.ne.s32.totalorder %s3910_s10, %s2735_s23  ;;  %p2742_p1 = scmp.lt.u32.totalorder %s2735_s23, %s3910_s10 }
 0x100   : > { %p2738_p9 = pnand %p2736_p7, %p3173_p8 }
 0x102   : > { %p2739_p3 = pneg %p2738_p9 }
 0x104   : > { %p2744_p4 = pnand %p2742_p1, %p2739_p3 }
 0x106   : > { %2747 = shalt.err (!%p2744_p4)
}
 0x107   : > { %s2748_s3 = scalar_lea.vmem %s567_s8, 256  ;;  %p2756_p13 = scmp.lt.s32.totalorder %s567_s8, %s567_s8 }
 0x108   : > { %p2749_p10 = scmp.ne.s32.totalorder %s567_s8, %s2748_s3  ;;  %p2757_p0 = scmp.lt.s32.totalorder %s2748_s3, %s2748_s3 }
 0x10a   : > { %p2751_p11 = pnand %p2749_p10, %p3173_p8  ;;  %p2758_p2 = por %p2757_p0, %p2756_p13 }
 0x10c   : > { %p2752_p12 = pneg %p2751_p11 }
 0x10e   : > { %p2759_p5 = pnand %p2758_p2, %p2752_p12 }
 0x110   : > { %2762 = shalt.err (!%p2759_p5)
}
 0x111   : > { %2350 = dma.hbm_to_vmem [thread:$0]  (!%p3159_p6), %s3910_s10, 256, %s567_s8, [#allocation17], %s3006_s22, %s3006_s22, %s3007_s14  }
 0x112   : > { %s3014_s26 = smov [#allocation21]   ;;  %s2763_s23 = scalar_lea.hbm %s3912_s12, 16 }
 0x113   : > { %s593_s24 = sshll.u32 %s3014_s26, 4  ;;  %p2764_p7 = scmp.ne.s32.totalorder %s3912_s12, %s2763_s23  ;;  %s594_s24 = int_to_ptr.vmem [resolvable:$true] %s593_s24 }
 0x114   : > { %p2770_p1 = scmp.lt.u32.totalorder %s2763_s23, %s3912_s12 }
 0x115   : > { %p2766_p9 = pnand %p2764_p7, %p3173_p8 }
 0x117   : > { %p2767_p3 = pneg %p2766_p9 }
 0x119   : > { %p2772_p4 = pnand %p2770_p1, %p2767_p3 }
 0x11b   : > { %2775 = shalt.err (!%p2772_p4)
}
 0x11c   : > { %s2776_s22 = scalar_lea.vmem %s594_s24, 16  ;;  %s2783_s14 = scalar_lea.vmem %s594_s24, 32 }
 0x11d   : > { %p2777_p10 = scmp.ne.s32.totalorder %s594_s24, %s2776_s22  ;;  %p2784_p13 = scmp.lt.s32.totalorder %s594_s24, %s594_s24 }
 0x11e   : > { %p2785_p0 = scmp.lt.s32.totalorder %s2783_s14, %s2776_s22 }
 0x11f   : > { %p2779_p11 = pnand %p2777_p10, %p3173_p8 }
 0x120   : > { %p2786_p2 = por %p2785_p0, %p2784_p13 }
 0x121   : > { %p2780_p12 = pneg %p2779_p11 }
 0x123   : > { %p2787_p5 = pnand %p2786_p2, %p2780_p12 }
 0x125   : > { %2790 = shalt.err (!%p2787_p5)
}
 0x126   : > { %2356 = dma.hbm_to_vmem [thread:$0]  (!%p3159_p6), %s3912_s12, 16, %s594_s24, [#allocation20]  }
 0x127   : > { %s3931_s2 = sadd.s32 4294967294, %s2999_s30   ;;  %s3374_s21 = sadd.s32 1, %s2999_s30  }
 0x128   : > { %s48_s0 = ssub.s32 %s2999_s30, %s3374_s21  ;;  %s51_s5 = sadd.s32 1, %s2995_s29 }
 0x129   : > { %p49_p8 = scmp.eq.s32.totalorder %s48_s0, 0  ;;  %p58_p7 = scmp.ne.s32.totalorder %s2995_s29, %s2991_s28 }
 0x12a   : > { %p59_p9 = scmp.eq.s32.totalorder %s2999_s30, 0  ;;  %p64_p3 = scmp.ne.s32.totalorder %s2991_s28, %s2987_s27 }
 0x12b   : > { %s3385_s26 = scalar_select %p49_p8, %s2995_s29, %s51_s5  }
 0x12c   : > { %p3387_p1 = por %p59_p9, %p58_p7  ;;  %p3962_p4 = scmp.eq.s32.totalorder %s3143_s1, 0 }
 0x12d   : > { %p3932_p10 = scmp.eq.s32.totalorder %s3143_s1, 3  ;;  %p388_p11 = scmp.eq.s32.totalorder %s3931_s2, 3 }
 0x12e   : > { %p3393_p6 = por %p3962_p4, %p64_p3  ;;  %p2378_p12 = scmp.lt.s32.totalorder %s2999_s30, 4 }
 0x12f   : > { %s610_s17 = sand.u32 1, %s2995_s29   ;;  %p3404_p13 = por %p3932_p10, %p58_p7 }
 0x130   : > { %p3408_p0 = por %p388_p11, %p64_p3  ;;  %s2133_s19 = sshll.u32 %s610_s17, 2 }
 0x131   : > { %s3964_s23 = scalar_select %p3404_p13, 1, 0 }
 0x132   : > { %s3965_s25 = scalar_select %p3408_p0, 1, 0 }
 0x133   : > { %s2134_s15 = sshll.u32 %s2999_s30, 6  ;;  %s3966_s14 = sld [smem:[#allocation38_spill]] }
 0x134   : > { %s614_s3 = scalar_lea.vmem [#allocation4], %s2133_s19  ;;  %p3422_p2 = pnand %p2378_p12, %p3387_p1 }
 0x135   : > { %s621_s0 = sshll.u32 %s614_s3, 4  ;;  %s611_s2 = scalar_lea.sflag [#allocation5], %s610_s17  ;;  %s3418_s0 = int_to_ptr.vmem [resolvable:$true] %s621_s0 }
 0x136   : > { %p2793_p8 = pneg %p3422_p2 }
 0x139   : > { %s3416_s8 = scalar_lea.hbm %s3966_s14, %s2134_s15  ;;  %s2796_s16 = scalar_lea.hbm %s3966_s14, 256 }
 0x13a   : > { %s2791_s4 = scalar_lea.hbm %s3416_s8, 64  ;;  %p2797_p3 = scmp.lt.u32.totalorder %s3416_s8, %s3966_s14 }
 0x13b   : > { %p2792_p5 = scmp.ne.s32.totalorder %s3416_s8, %s2791_s4  ;;  %p2798_p1 = scmp.lt.u32.totalorder %s2796_s16, %s2791_s4 }
 0x13c   : > { %p2800_p11 = scmp.lt.u32.totalorder %s2791_s4, %s3416_s8 }
 0x13d   : > { %p2794_p7 = pnand %p2793_p8, %p2792_p5  ;;  %p2799_p4 = por %p2798_p1, %p2797_p3 }
 0x13f   : > { %p2795_p9 = pneg %p2794_p7  ;;  %p2801_p12 = por %p2800_p11, %p2799_p4 }
 0x141   : > { %p2802_p10 = pnand %p2801_p12, %p2795_p9 }
 0x143   : > { %2805 = shalt.err (!%p2802_p10)
}
 0x144   : > { %s2806_s17 = scalar_lea.vmem %s3418_s0, 64  ;;  %s3015_s3 = smov [#allocation4]  }
 0x145   : > { %p2807_p5 = scmp.ne.s32.totalorder %s3418_s0, %s2806_s17  ;;  %s2811_s19 = sshll.u32 %s3015_s3, 4  ;;  %s2812_s19 = int_to_ptr.vmem [resolvable:$false] %s2811_s19 }
 0x146   : > { %s2813_s15 = scalar_lea.vmem %s2812_s19, 128  ;;  %p2814_p13 = scmp.lt.s32.totalorder %s3418_s0, %s2812_s19 }
 0x147   : > { %p2809_p7 = pnand %p2807_p5, %p2793_p8  ;;  %p2815_p3 = scmp.lt.s32.totalorder %s2813_s15, %s2806_s17 }
 0x149   : > { %p2810_p0 = pneg %p2809_p7  ;;  %p2816_p1 = por %p2815_p3, %p2814_p13 }
 0x14b   : > { %p2817_p4 = pnand %p2816_p1, %p2810_p0 }
 0x14d   : > { %2820 = shalt.err (!%p2817_p4)
}
 0x14e   : > { %2360 = dma.hbm_to_vmem [thread:$0]  (!%p3422_p2), %s3416_s8, 64, %s3418_s0, %s611_s2  }
 0x14f   : > { %p3968_p10 = scmp.ne.s32.totalorder %s3951_s20, 0 }
 0x150   : > { %s3454_s4 = sand.u32 (!%p3968_p10), 1, %s2991_s28  }
 0x151   : > { %630 = sbr.rel (%p3968_p10) target bundleno = 2987 (0xbab), region = 80  ;;  %s2136_s16 = sshll.u32 (!%p3968_p10), %s3454_s4, 2 }
 0x152   : > { %s633_s13 = scalar_lea.sflag (!%p3968_p10), [#allocation5], %s3454_s4  ;;  %s3458_s22 = scalar_lea.vmem (!%p3968_p10), [#allocation4], %s2136_s16 }
 0x158   : > { %2946 = dma.done.wait (%p3393_p6), %s633_s13, 64  }
 0x159   : > { %2948 = vsyncadd (%p3393_p6), %s633_s13, 4294967232  ;;  %p3969_p13 = scmp.eq.s32.totalorder %s3143_s1, 0 }
 0x15b   : > { %2950 = dma.done.wait (%p3969_p13), [#allocation8], 256   ;;  %p3970_p0 = pmov %p3969_p13 }
 0x15d   : > { %2952 = vsyncadd (%p3970_p0), [#allocation8], 4294967040  ;;  %p3971_p2 = pmov %p3970_p0 }
 0x15e   : > { %p3972_p8 = pmov %p3970_p0 }
 0x15f   : > { %2954 = dma.done.wait (%p3971_p2), [#allocation11], 1280  }
 0x160   : > { %2956 = vsyncadd (%p3972_p8), [#allocation11], 4294966016  ;;  %p3973_p9 = pmov %p3970_p0 }
 0x161   : > { %p3974_p11 = pmov %p3970_p0 }
 0x162   : > { %2958 = dma.done.wait (%p3973_p9), [#allocation14], 512  }
 0x163   : > { %2960 = vsyncadd (%p3974_p11), [#allocation14], 4294966784  ;;  %p3975_p6 = pmov %p3970_p0 }
 0x164   : > { %p3976_p12 = pmov %p3970_p0 }
 0x165   : > { %2962 = dma.done.wait (%p3975_p6), [#allocation17], 272  }
 0x166   : > { %2964 = vsyncadd (%p3976_p12), [#allocation17], 4294967024  ;;  %p3977_p5 = pmov %p3970_p0 }
 0x167   : > { %p3978_p7 = pmov %p3970_p0 }
 0x168   : > { %2966 = dma.done.wait (%p3977_p5), [#allocation20], 272  }
 0x169   : > { %2968 = vsyncadd (%p3978_p7), [#allocation20], 4294967024  ;;  %s2147_s20 = sshll.u32 %s3454_s4, 3  ;;  %p3979_p3 = scmp.ne.s32.totalorder %s3143_s1, 0 }
 0x16a   : > { %s3485_s2 = scalar_lea.vmem [#allocation22], %s2147_s20  ;;  %s3487_s24 = scalar_lea.vmem [#allocation23], %s2147_s20  ;;  %v739_v0 = vld [vmem:[#allocation7] sm:$0xff] (!%p3979_p3)  ;;  %vm740_vm0 = vcmask (!%p3979_p3), 261120   ;;  %v742_v1 = vld [vmem:[#allocation9] sm:$0xff] (!%p3979_p3) }
 0x16b   : > { %738 = sbr.rel (%p3979_p3) target bundleno = 370 (0x172), region = 128  ;;  %741 = vst.msk [vmem:[#allocation2] sm:$0xff] (!%p3979_p3), %vm740_vm0, %v739_v0  ;;  %743 = vst.msk [vmem:[#allocation3] sm:$0xff] (!%p3979_p3), %vm740_vm0, %v742_v1 }
 0x172 PF: > { %v2451_v2 = vld [vmem:[#allocation13] sm:$0xff]   ;;  %v3016_v3 = vmov 0.0   ;;  %v2452_v4 = vld [vmem:[#allocation15] sm:$0xff]   ;;  %v2453_v5 = vld [vmem:[#allocation13 + $0x8] sm:$0xff]   ;;  %vm3017_vm1 = vmmov 0   ;;  %vm768_vm2 = vcmask 261120   ;;  %v1048_v55 = vlaneseq }
 0x173   : > { %2212 = vmatprep.subr.bf16.mxu1 %v3016_v3  ;;  %2228 = vmatprep.subr.bf16.mxu0 %v3016_v3  ;;  %v2454_v6 = vld [vmem:[#allocation15 + $0x8] sm:$0xff]   ;;  %v746_v7 = vld [vmem:[#allocation3] sm:$0xff]  ;;  %v3499_v8 = vld [vmem:[#allocation2] sm:$0xff]  ;;  %s3980_s5 = sld [smem:[#allocation43_spill]]  ;;  %s3018_s19 = smov 64   ;;  %vm1207_vm3 = vcmask 1041409  }
 0x174   : > { %2213 = vmatpush3.bf16.msra.mxu1 %v2451_v2  ;;  %2216 = vmatprep.mubr.msk.bf16.mxu1 %vm3017_vm1, %v3016_v3  ;;  %v751_v9 = vpack.c.bf16 %v746_v7, %v746_v7  ;;  %v875_v10 = vpack.c.bf16 %v3499_v8, %v3499_v8  ;;  %v744_v13 = vld [vmem:[%s3458_s22] sm:$0xf]  ;;  %v2157_v14 = vld [vmem:[#allocation16] ss:$0 sm:$0xff]  ;;  %s3981_s13 = sld [smem:[#allocation46_spill]]  ;;  %v2457_v40 = vld [vmem:[#allocation12] sm:$0xff]  }
 0x175   : > { %2229 = vmatpush3.bf16.msra.mxu0 %v2452_v4  ;;  %2214 = vmatprep.subr.bf16.mxu1 %v3016_v3  ;;  %v2458_v41 = vld [vmem:[#allocation19] sm:$0xff]   ;;  %v2460_v44 = vld [vmem:[#allocation19 + $0x8] sm:$0xff]   ;;  %s3019_s22 = smov 96   ;;  %s3020_s20 = smov 32   ;;  %v3021_v53 = vmov 1966171168  }
 0x176   : > { %2230 = vmatprep.subr.bf16.mxu0 %v3016_v3  ;;  %2232 = vmatprep.mubr.msk.bf16.mxu0 %vm3017_vm1, %v3016_v3  ;;  %v2459_v43 = vld [vmem:[#allocation12 + $0x8] sm:$0xff]   ;;  %v1046_v54 = vunpack.c.l.s4 %v3021_v53  ;;  %v3544_v57 = vshrl.u32 %v1048_v55, 7  ;;  %vm1209_vm4 = vcmask 1042434   ;;  %vm1211_vm5 = vcmask 1043459   ;;  %s3982_s17 = sld [smem:[#allocation48_spill]]  ;;  %s3983_s3 = sld [smem:[#allocation49_spill]] }
 0x177   : > { %vm1213_vm6 = vcmask 1044484   ;;  %vm1215_vm7 = vcmask 1045509   ;;  %vm1217_vm8 = vcmask 1046534   ;;  %vm1219_vm9 = vcmask 1047559   ;;  %p2178_p1 = scmp.ne.s32.totalorder %s3143_s1, 3 }
 0x178   : > { %2215 = vmatpush3.bf16.msra.mxu1 %v2453_v5  ;;  %v1047_v56 = vunpack.c.0.s8 %v1046_v54  ;;  %v3550_v4 = vsub.s32 0, %v3544_v57  ;;  %vm1222_vm10 = vcmask 64512   ;;  %vm1723_vm11 = vcmask 523264  }
 0x179   : > { %v2455_v11 = vld [vmem:[%s3980_s5] sm:$0xff]   ;;  %2231 = vmatpush3.bf16.msra.mxu0 %v2454_v6  ;;  %2220 = vmatprep.subr.bf16.mxu1 %v3016_v3  ;;  %v2456_v12 = vld [vmem:[%s3980_s5 + $0x8] sm:$0xff]  }
 0x17a   : > { %2244 = vmatprep.subr.bf16.mxu0 %v3016_v3  ;;  %v2156_v29 = vld [vmem:[%s3981_s13] ss:$0 sm:$0xff]  ;;  %v1050_v58 = vsub.s32 %v1047_v56, %v3544_v57 }
 0x17b   : > { %2217 = vmatmul.mubr.msk.bf16.vlgmr.msra.gmra.mrb[0].mxu1 %vm768_vm2, %v751_v9 }
 0x17c   : > { %2233 = vmatmul.mubr.msk.bf16.vlgmr.msra.gmra.mrb[0].mxu0 %vm768_vm2, %v875_v10  ;;  %2221 = vmatpush3.bf16.msra.mxu1 %v2455_v11 }
 0x17d   : > { %2222 = vmatprep.subr.bf16.mxu1 %v3016_v3  ;;  %2224 = vmatprep.mubr.msk.bf16.mxu1 %vm3017_vm1, %v3016_v3 }
 0x17e   : > { %2248 = vmatprep.mubr.msk.bf16.mxu0 %vm3017_vm1, %v3016_v3  ;;  %2245 = vmatpush3.bf16.msra.mxu0 %v2458_v41  ;;  %v3581_v41 = vld [vmem:[#allocation10 + $0x38] sm:$0xff] }
 0x17f   : > { %2246 = vmatprep.subr.bf16.mxu0 %v3016_v3 }
 0x180   : > { %2223 = vmatpush3.bf16.msra.mxu1 %v2456_v12 }
 0x181   : > { %2236 = vmatprep.subr.bf16.mxu1 %v3016_v3 }
 0x182   : > { %2247 = vmatpush3.bf16.msra.mxu0 %v2460_v44 }
 0x183   : > { %2225 = vmatmul.mubr.msk.bf16.vlgmr.msra.gmra.mrb[4].mxu1 %vm768_vm2, %v744_v13  ;;  %2260 = vmatprep.subr.bf16.mxu0 %v3016_v3  ;;  %v3552_v13 = vld [vmem:[#allocation10] sm:$0xff] }
 0x184   : > { %2240 = vmatprep.mubr.msk.bf16.mxu1 %vm3017_vm1, %v3016_v3  ;;  %2237 = vmatpush3.bf16.msra.mxu1 %v2457_v40 }
 0x185   : > { %2238 = vmatprep.subr.bf16.mxu1 %v3016_v3 }
 0x188   : > { %2239 = vmatpush3.bf16.msra.mxu1 %v2459_v43  ;;  %v3584_v43 = vld [vmem:[#allocation10 + $0x30] sm:$0xff] }
 0x189   : > { %2252 = vmatprep.subr.bf16.mxu1 %v3016_v3 }
 0x24e   : > { %v806_v15 = vpop.f32.mrb[0].mxu1 }
 0x24f   : > { %v936_v16 = vpop.f32.mrb[0].mxu0  ;;  %v2218_v17 = vpop.f32.mrb[1].mxu1 }
 0x250   : > { %v937_v18 = vadd.f32 %v2157_v14, %v936_v16  ;;  %v2234_v19 = vpop.f32.mrb[1].mxu0  ;;  %v809_v20 = vpop.f32.mrb[2].mxu1  ;;  %v3555_v16 = vld [vmem:[#allocation10 + $0x8] sm:$0xff] }
 0x251   : > { %v939_v21 = vpop.f32.mrb[2].mxu0  ;;  %v2219_v22 = vpop.f32.mrb[3].mxu1 }
 0x252   : > { %950 = vrot.lane.b32.xlu0 %v937_v18, %s3018_s19  ;;  %v2235_v23 = vpop.f32.mrb[3].mxu0  ;;  %v3560_v22 = vld [vmem:[#allocation10 + $0x18] sm:$0xff] }
 0x253   : > { %v3562_v23 = vld [vmem:[#allocation10 + $0x10] sm:$0xff] }
 0x256   : > { %v861_v24 = vpop.f32.mrb[4].mxu1 }
 0x257   : > { %v862_v25 = vadd.f32 %v861_v24, %v806_v15  ;;  %v2226_v26 = vpop.f32.mrb[5].mxu1 }
 0x258   : > { %v864_v27 = vpop.f32.mrb[6].mxu1 }
 0x259   : > { %v2227_v28 = vpop.f32.mrb[7].mxu1  ;;  %v874_v30 = vadd.f32 %v2156_v29, %v862_v25 }
 0x25b   : > { %v942_v31 = vadd.f32 %v937_v18, %v874_v30 }
 0x25d   : > { %v2161_v32 = vmul.f32 -1.442695, %v942_v31 }
 0x25f   : > { %2467 = vpow2.f32 %v2161_v32 }
 0x269   : > { %v2468_v33 = vpop.eup %2467 }
 0x26a   : > { %v946_v34 = vadd.f32 1.0, %v2468_v33  ;;  %v3572_v33 = vld [vmem:[#allocation10 + $0x28] sm:$0xff] }
 0x26c   : > { %2469 = vrcp.f32 %v946_v34 }
 0x276   : > { %v2470_v35 = vpop.eup %2469 }
 0x277   : > { %v960_v46 = vsub.f32 1.0, %v2470_v35 }
 0x2c4   : > { %v951_v36 = vpop.permute.xlu0 %950 }
 0x2c5   : > { %v953_v37 = vmul.f32 %v2470_v35, %v951_v36 }
 0x2c7   : > { %955 = vrot.lane.b32.xlu0 %v953_v37, %s3018_s19 }
 0x339   : > { %v956_v38 = vpop.permute.xlu0 %955 }
 0x33a   : > { %v958_v39 = vadd.f32 %v956_v38, %v874_v30 }
 0x33c   : > { %2471 = vtanh.f32 %v958_v39 }
 0x346   : > { %v2472_v42 = vpop.eup %2471 }
 0x347   : > { %962 = vrot.lane.b32.xlu1 %v2472_v42, %s3019_s22 }
 0x34b   : > { %967 = vrot.lane.b32.xlu1 %v3499_v8, %s3020_s20 }
 0x3b9   : > { %v963_v45 = vpop.permute.xlu1 %962 }
 0x3ba   : > { %v965_v48 = vmul.f32 %v963_v45, %v960_v46 }
 0x3bd   : > { %v968_v47 = vpop.permute.xlu1 %967 }
 0x3be   : > { %v970_v49 = vmul.f32 %v2470_v35, %v968_v47  ;;  %v3574_v35 = vld [vmem:[#allocation10 + $0x20] sm:$0xff] }
 0x3c0   : > { %v3532_v50 = vadd.f32 %v970_v49, %v965_v48 }
 0x3c2   : > { %v972_v51 = vpack.c.bf16 %v3532_v50, %v3532_v50 }
 0x3c4   : > { %978 = vrot.lane.b32.xlu0 %v972_v51, %s3019_s22  ;;  %v1174_v51 = vand.u32 127, %v1048_v55 }
 0x3c6   : > { %v3594_v53 = vsub.s32 %v1174_v51, %v3544_v57 }
 0x436   : > { %v979_v52 = vpop.permute.xlu0 %978 }
 0x437   : > { %2241 = vmatmul.mubr.msk.bf16.vlgmr.msra.gmra.mrb[8].mxu1 %vm768_vm2, %v979_v52  ;;  %2249 = vmatmul.mubr.msk.bf16.vlgmr.msra.gmra.mrb[4].mxu0 %vm768_vm2, %v979_v52 }
 0x438   : > { %2256 = vmatprep.mubr.msk.bf16.mxu1 %vm3017_vm1, %v3016_v3  ;;  %2268 = vmatprep.mubr.msk.bf16.mxu0 %vm3017_vm1, %v3016_v3 }
 0x50a   : > { %v1029_v59 = vpop.f32.mrb[8].mxu1  ;;  %v3547_v60 = vpop.f32.mrb[4].mxu0 }
 0x50b   : > { %v1044_v61 = vcombine.high %v1029_v59, %v1029_v59  ;;  %v1051_v62 = vrot.slane %v1029_v59, %v1050_v58  ;;  %v2242_v63 = vpop.f32.mrb[9].mxu1  ;;  %v2250_v0 = vpop.f32.mrb[5].mxu0 }
 0x50c   : > { %v1032_v1 = vpop.f32.mrb[10].mxu1  ;;  %v1592_v2 = vpop.f32.mrb[6].mxu0 }
 0x50d   : > { %v1058_v5 = vrot.slane %v1044_v61, %v1050_v58  ;;  %v1059_v6 = vcombine.high %v1051_v62, %v1051_v62  ;;  %v1067_v7 = vrot.slane %v1051_v62, %v1050_v58  ;;  %v2243_v8 = vpop.f32.mrb[11].mxu1  ;;  %v2251_v9 = vpop.f32.mrb[7].mxu0 }
 0x50f   : > { %v1060_v10 = vcombine.high %v1058_v5, %v1058_v5  ;;  %v1081_v11 = vrot.slane %v1059_v6, %v1050_v58  ;;  %v1089_v12 = vcombine.high %v1067_v7, %v1067_v7  ;;  %v1074_v14 = vrot.slane %v1058_v5, %v1050_v58 }
 0x510   : > { %v1096_v15 = vrot.slane %v1067_v7, %v3550_v4 }
 0x511   : > { %v1100_v17 = vrot.slane %v1081_v11, %v3550_v4  ;;  %v1091_v18 = vcombine.high %v1081_v11, %v1081_v11  ;;  %v1104_v19 = vrot.slane %v1089_v12, %v3550_v4  ;;  %v1088_v20 = vrot.slane %v1060_v10, %v1050_v58 }
 0x512   : > { %v1133_v21 = vmul.f32 %v1096_v15, %v3552_v13  ;;  %v1112_v28 = vrot.slane %v1074_v14, %v3550_v4  ;;  %v1090_v34 = vcombine.high %v1074_v14, %v1074_v14 }
 0x513   : > { %v1134_v24 = vmul.f32 %v1100_v17, %v3555_v16  ;;  %v1108_v25 = vrot.slane %v1091_v18, %v3550_v4  ;;  %v1116_v27 = vrot.slane %v1088_v20, %v3550_v4  ;;  %v1092_v29 = vcombine.high %v1088_v20, %v1088_v20 }
 0x514   : > { %v1141_v26 = vsel %vm768_vm2, %v1133_v21, 0.0  ;;  %v1135_v32 = vmul.f32 %v1104_v19, %v3562_v23  ;;  %v1137_v40 = vmul.f32 %v1112_v28, %v3574_v35  ;;  %v1120_v42 = vrot.slane %v1090_v34, %v3550_v4 }
 0x515   : > { %1142 = vadd.xlane.f32.xlu1 %v1141_v26  ;;  %v1144_v30 = vsel %vm768_vm2, %v1134_v24, 0.0  ;;  %v1136_v31 = vmul.f32 %v1108_v25, %v3560_v22  ;;  %v1138_v37 = vmul.f32 %v1116_v27, %v3572_v33  ;;  %v1124_v38 = vrot.slane %v1092_v29, %v3550_v4 }
 0x516   : > { %1145 = vadd.xlane.f32.xlu0 %v1144_v30  ;;  %v1147_v39 = vsel %vm768_vm2, %v1135_v32, 0.0  ;;  %v1153_v46 = vsel %vm768_vm2, %v1137_v40, 0.0  ;;  %v1139_v47 = vmul.f32 %v1120_v42, %v3584_v43  ;;  %v3022_v19 = vmov 0  }
 0x517   : > { %v1150_v36 = vsel %vm768_vm2, %v1136_v31, 0.0  ;;  %v1156_v44 = vsel %vm768_vm2, %v1138_v37, 0.0  ;;  %v1140_v45 = vmul.f32 %v1124_v38, %v3581_v41  ;;  %2450 = vset.pattern.permute.xlu0 %v3022_v19  ;;  %2449 = vset.pattern.permute.xlu1 %v3022_v19  ;;  %v1233_v20 = vsub.s32 1, %v3544_v57 }
 0x518   : > { %v1159_v49 = vsel %vm768_vm2, %v1139_v47, 0.0  ;;  %v1237_v21 = vsub.s32 2, %v3544_v57  ;;  %v1241_v24 = vsub.s32 3, %v3544_v57  ;;  %v1245_v29 = vsub.s32 4, %v3544_v57 }
 0x519   : > { %1151 = vadd.xlane.f32.xlu1 %v1150_v36  ;;  %v1162_v48 = vsel %vm768_vm2, %v1140_v45, 0.0  ;;  %v1249_v38 = vsub.s32 5, %v3544_v57 }
 0x51a   : > { %1148 = vadd.xlane.f32.xlu0 %v1147_v39 }
 0x51d   : > { %1157 = vadd.xlane.f32.xlu1 %v1156_v44  ;;  %v1253_v44 = vsub.s32 6, %v3544_v57 }
 0x51e   : > { %1154 = vadd.xlane.f32.xlu0 %v1153_v46 }
 0x521   : > { %1163 = vadd.xlane.f32.xlu1 %v1162_v48  ;;  %v1257_v48 = vsub.s32 7, %v3544_v57 }
 0x522   : > { %1160 = vadd.xlane.f32.xlu0 %v1159_v49 }
 0x5a2   : > { %v1143_v52 = vpop.xlane.xlu1 %1142 }
 0x5a3   : > { %v1146_v54 = vpop.xlane.xlu0 %1145  ;;  %v1178_v59 = vrot.slane %v1143_v52, %v3594_v53 }
 0x5a4   : > { %v1182_v56 = vrot.slane %v1146_v54, %v3594_v53 }
 0x5a6   : > { %v1152_v58 = vpop.xlane.xlu1 %1151  ;;  %v1208_v63 = vsel %vm1207_vm3, %v1182_v56, %v1178_v59 }
 0x5a7   : > { %v1149_v61 = vpop.xlane.xlu0 %1148  ;;  %v1190_v1 = vrot.slane %v1152_v58, %v3594_v53 }
 0x5a8   : > { %v1186_v62 = vrot.slane %v1149_v61, %v3594_v53 }
 0x5aa   : > { %v1210_v0 = vsel %vm1209_vm4, %v1186_v62, %v1208_v63  ;;  %v1158_v55 = vpop.xlane.xlu1 %1157 }
 0x5ab   : > { %v1155_v2 = vpop.xlane.xlu0 %1154  ;;  %v1212_v6 = vsel %vm1211_vm5, %v1190_v1, %v1210_v0  ;;  %v1198_v9 = vrot.slane %v1158_v55, %v3594_v53 }
 0x5ac   : > { %v1194_v5 = vrot.slane %v1155_v2, %v3594_v53 }
 0x5ae   : > { %v1214_v7 = vsel %vm1213_vm6, %v1194_v5, %v1212_v6  ;;  %v3605_v8 = vpop.xlane.xlu1 %1163 }
 0x5af   : > { %v1161_v10 = vpop.xlane.xlu0 %1160  ;;  %v1206_v12 = vrot.slane %v3605_v8, %v3594_v53  ;;  %v1216_v14 = vsel %vm1215_vm7, %v1198_v9, %v1214_v7 }
 0x5b0   : > { %v1202_v11 = vrot.slane %v1161_v10, %v3594_v53 }
 0x5b2   : > { %v1218_v15 = vsel %vm1217_vm8, %v1202_v11, %v1216_v14 }
 0x5b3   : > { %v1220_v17 = vsel %vm1219_vm9, %v1206_v12, %v1218_v15 }
 0x5b4   : > { %v1223_v18 = vsel %vm1222_vm10, %v1220_v17, -inf }
 0x5b5   : > { %1224 = vmax.xlane.f32.xlu0 %v1223_v18 }
 0x642   : > { %v1225_v25 = vpop.xlane.xlu0 %1224 }
 0x643   : > { %v1230_v26 = vrot.slane %v1225_v25, %v3550_v4  ;;  %v1234_v27 = vrot.slane %v1225_v25, %v1233_v20  ;;  %v1238_v28 = vrot.slane %v1225_v25, %v1237_v21  ;;  %v1242_v30 = vrot.slane %v1225_v25, %v1241_v24 }
 0x644   : > { %v1246_v39 = vrot.slane %v1225_v25, %v1245_v29  ;;  %v1250_v45 = vrot.slane %v1225_v25, %v1249_v38  ;;  %v1254_v49 = vrot.slane %v1225_v25, %v1253_v44 }
 0x645   : > { %v1267_v31 = vsub.f32 %v1143_v52, %v1230_v26  ;;  %v1268_v32 = vsub.f32 %v1146_v54, %v1234_v27  ;;  %v1269_v34 = vsub.f32 %v1149_v61, %v1238_v28  ;;  %v1270_v40 = vsub.f32 %v1152_v58, %v1242_v30 }
 0x646   : > { %v1271_v46 = vsub.f32 %v1155_v2, %v1246_v39  ;;  %v1272_v51 = vsub.f32 %v1158_v55, %v1250_v45  ;;  %v1258_v58 = vrot.slane %v1225_v25, %v1257_v48  ;;  %v1273_v59 = vsub.f32 %v1161_v10, %v1254_v49 }
 0x647   : > { %v1275_v36 = vmul.f32 1.442695, %v1267_v31  ;;  %v1277_v37 = vmul.f32 1.442695, %v1268_v32  ;;  %v1279_v42 = vmul.f32 1.442695, %v1269_v34 }
 0x648   : > { %v1281_v47 = vmul.f32 1.442695, %v1270_v40  ;;  %v1283_v52 = vmul.f32 1.442695, %v1271_v46  ;;  %v1285_v61 = vmul.f32 1.442695, %v1272_v51  ;;  %v1274_v63 = vsub.f32 %v3605_v8, %v1258_v58 }
 0x649   : > { %2473 = vpow2.f32 %v1275_v36  ;;  %v1287_v0 = vmul.f32 1.442695, %v1273_v59 }
 0x64a   : > { %2475 = vpow2.f32 %v1277_v37  ;;  %v1289_v1 = vmul.f32 1.442695, %v1274_v63 }
 0x64b   : > { %2477 = vpow2.f32 %v1279_v42 }
 0x64c   : > { %2479 = vpow2.f32 %v1281_v47 }
 0x64d   : > { %2481 = vpow2.f32 %v1283_v52 }
 0x64e   : > { %2483 = vpow2.f32 %v1285_v61 }
 0x64f   : > { %2485 = vpow2.f32 %v1287_v0 }
 0x650   : > { %2487 = vpow2.f32 %v1289_v1 }
 0x653   : > { %v2474_v54 = vpop.eup %2473 }
 0x654   : > { %v3635_v56 = vpop.eup %2475  ;;  %1300 = vperm.xlu1 %2449, %v2474_v54  }
 0x655   : > { %1303 = vperm.xlu0 %2450, %v3635_v56   ;;  %v3640_v62 = vpop.eup %2477 }
 0x656   : > { %v3644_v55 = vpop.eup %2479 }
 0x657   : > { %v3647_v2 = vpop.eup %2481 }
 0x658   : > { %1306 = vperm.xlu1 %2449, %v3640_v62   ;;  %v3650_v5 = vpop.eup %2483 }
 0x659   : > { %v3653_v6 = vpop.eup %2485 }
 0x65a   : > { %v3656_v7 = vpop.eup %2487 }
 0x65c   : > { %1309 = vperm.xlu1 %2449, %v3644_v55  }
 0x660   : > { %1312 = vperm.xlu1 %2449, %v3647_v2  }
 0x664   : > { %1315 = vperm.xlu1 %2449, %v3650_v5  }
 0x668   : > { %1318 = vperm.xlu1 %2449, %v3653_v6  }
 0x66c   : > { %1321 = vperm.xlu1 %2449, %v3656_v7  }
 0x6d3   : > { %v1301_v8 = vpop.permute.xlu1 %1300 }
 0x6d4   : > { %v1304_v12 = vpop.permute.xlu0 %1303  ;;  %v1326_v17 = vrot.slane %v1301_v8, %v3594_v53 }
 0x6d5   : > { %v1330_v15 = vrot.slane %v1304_v12, %v3594_v53 }
 0x6d7   : > { %v1307_v9 = vpop.permute.xlu1 %1306  ;;  %v1355_v27 = vsel %vm1207_vm3, %v1330_v15, %v1326_v17 }
 0x6d8   : > { %v1334_v18 = vrot.slane %v1307_v9, %v3594_v53 }
 0x6da   : > { %v1356_v30 = vsel %vm1209_vm4, %v1334_v18, %v1355_v27 }
 0x6db   : > { %v1310_v10 = vpop.permute.xlu1 %1309 }
 0x6dc   : > { %v1338_v19 = vrot.slane %v1310_v10, %v3594_v53 }
 0x6de   : > { %v1357_v32 = vsel %vm1211_vm5, %v1338_v19, %v1356_v30 }
 0x6df   : > { %v1313_v11 = vpop.permute.xlu1 %1312 }
 0x6e0   : > { %v1342_v25 = vrot.slane %v1313_v11, %v3594_v53 }
 0x6e2   : > { %v1358_v34 = vsel %vm1213_vm6, %v1342_v25, %v1357_v32 }
 0x6e3   : > { %v1316_v14 = vpop.permute.xlu1 %1315 }
 0x6e4   : > { %v1346_v28 = vrot.slane %v1316_v14, %v3594_v53 }
 0x6e6   : > { %v1359_v37 = vsel %vm1215_vm7, %v1346_v28, %v1358_v34 }
 0x6e7   : > { %v1319_v26 = vpop.permute.xlu1 %1318 }
 0x6e8   : > { %v1350_v31 = vrot.slane %v1319_v26, %v3594_v53 }
 0x6ea   : > { %v1360_v40 = vsel %vm1217_vm8, %v1350_v31, %v1359_v37 }
 0x6eb   : > { %v1322_v36 = vpop.permute.xlu1 %1321 }
 0x6ec   : > { %v1354_v39 = vrot.slane %v1322_v36, %v3594_v53 }
 0x6ee   : > { %v1361_v42 = vsel %vm1219_vm9, %v1354_v39, %v1360_v40 }
 0x6ef   : > { %v1363_v45 = vsel %vm1222_vm10, %v1361_v42, 0.0 }
 0x6f0   : > { %1364 = vadd.xlane.f32.xlu1 %v1363_v45 }
 0x77d   : > { %v1365_v46 = vpop.xlane.xlu1 %1364 }
 0x77e   : > { %v1370_v47 = vrot.slane %v1365_v46, %v3550_v4  ;;  %v1374_v49 = vrot.slane %v1365_v46, %v1233_v20  ;;  %v1378_v51 = vrot.slane %v1365_v46, %v1237_v21  ;;  %v1382_v52 = vrot.slane %v1365_v46, %v1241_v24 }
 0x77f   : > { %v1386_v59 = vrot.slane %v1365_v46, %v1245_v29  ;;  %v1390_v4 = vrot.slane %v1365_v46, %v1249_v38  ;;  %v1394_v21 = vrot.slane %v1365_v46, %v1253_v44  ;;  %v1398_v29 = vrot.slane %v1365_v46, %v1257_v48  ;;  %v2461_v48 = vld [vmem:[#allocation18] sm:$0xff]  }
 0x780   : > { %2489 = vrcp.f32 %v1370_v47  ;;  %2253 = vmatpush3.bf16.msra.mxu1 %v2461_v48 }
 0x781   : > { %2491 = vrcp.f32 %v1374_v49  ;;  %2254 = vmatprep.subr.bf16.mxu1 %v3016_v3 }
 0x782   : > { %2493 = vrcp.f32 %v1378_v51 }
 0x783   : > { %2495 = vrcp.f32 %v1382_v52 }
 0x784   : > { %2497 = vrcp.f32 %v1386_v59 }
 0x785   : > { %2499 = vrcp.f32 %v1390_v4 }
 0x786   : > { %2501 = vrcp.f32 %v1394_v21 }
 0x787   : > { %2503 = vrcp.f32 %v1398_v29 }
 0x78a   : > { %v2490_v58 = vpop.eup %2489 }
 0x78b   : > { %v1408_v61 = vmul.f32 %v2490_v58, %v2474_v54  ;;  %v2492_v63 = vpop.eup %2491 }
 0x78c   : > { %v1410_v20 = vmul.f32 %v2492_v63, %v3635_v56  ;;  %v2494_v0 = vpop.eup %2493 }
 0x78d   : > { %1425 = vperm.xlu0 %2450, %v1408_v61   ;;  %v1412_v24 = vmul.f32 %v2494_v0, %v3640_v62  ;;  %v2496_v1 = vpop.eup %2495 }
 0x78e   : > { %v1414_v54 = vmul.f32 %v2496_v1, %v3644_v55  ;;  %v2498_v8 = vpop.eup %2497  ;;  %v2462_v55 = vld [vmem:[#allocation18 + $0x8] sm:$0xff]  }
 0x78f   : > { %v1416_v38 = vmul.f32 %v2498_v8, %v3647_v2  ;;  %v2500_v56 = vpop.eup %2499  ;;  %2255 = vmatpush3.bf16.msra.mxu1 %v2462_v55 }
 0x790   : > { %v1418_v9 = vmul.f32 %v2500_v56, %v3650_v5  ;;  %v2502_v44 = vpop.eup %2501 }
 0x791   : > { %1430 = vperm.xlu0 %2450, %v1410_v20   ;;  %v1420_v62 = vmul.f32 %v2502_v44, %v3653_v6  ;;  %v2504_v10 = vpop.eup %2503 }
 0x792   : > { %v1422_v57 = vmul.f32 %v2504_v10, %v3656_v7 }
 0x795   : > { %1435 = vperm.xlu0 %2450, %v1412_v24  }
 0x799   : > { %1440 = vperm.xlu0 %2450, %v1414_v54  }
 0x79d   : > { %1445 = vperm.xlu0 %2450, %v1416_v38  }
 0x7a1   : > { %1450 = vperm.xlu0 %2450, %v1418_v9  }
 0x7a5   : > { %1455 = vperm.xlu0 %2450, %v1420_v62  }
 0x7a9   : > { %1460 = vperm.xlu0 %2450, %v1422_v57  }
 0x80c   : > { %v1426_v2 = vpop.permute.xlu0 %1425 }
 0x80d   : > { %v1463_v11 = vmul.f32 %v1426_v2, %v3552_v13  ;;  %v1782_v47 = vrot.slane %v1426_v2, %v3594_v53 }
 0x80f   : > { %v1471_v14 = vsel %vm768_vm2, %v1463_v11, 0.0 }
 0x810   : > { %v1431_v12 = vpop.permute.xlu0 %1430  ;;  %v1472_v17 = vrot.slane %v1471_v14, 4 }
 0x811   : > { %v1464_v5 = vmul.f32 %v1431_v12, %v3555_v16  ;;  %v1786_v39 = vrot.slane %v1431_v12, %v3594_v53 }
 0x812   : > { %v1473_v28 = vadd.f32 %v1472_v17, %v1471_v14 }
 0x813   : > { %v1478_v6 = vsel %vm768_vm2, %v1464_v5, 0.0  ;;  %v1811_v61 = vsel %vm1207_vm3, %v1786_v39, %v1782_v47 }
 0x814   : > { %v1436_v15 = vpop.permute.xlu0 %1435  ;;  %v1479_v18 = vrot.slane %v1478_v6, 4  ;;  %v1474_v36 = vrot.slane %v1473_v28, 2 }
 0x815   : > { %v1465_v7 = vmul.f32 %v1436_v15, %v3562_v23  ;;  %v1790_v45 = vrot.slane %v1436_v15, %v3594_v53 }
 0x816   : > { %v1480_v13 = vadd.f32 %v1479_v18, %v1478_v6 }
 0x817   : > { %v1485_v19 = vsel %vm768_vm2, %v1465_v7, 0.0  ;;  %v1812_v0 = vsel %vm1209_vm4, %v1790_v45, %v1811_v61 }
 0x818   : > { %v1486_v25 = vrot.slane %v1485_v19, 4  ;;  %v1441_v26 = vpop.permute.xlu0 %1440  ;;  %v1481_v37 = vrot.slane %v1480_v13, 2 }
 0x819   : > { %v1466_v27 = vmul.f32 %v1441_v26, %v3560_v22  ;;  %v1794_v49 = vrot.slane %v1441_v26, %v3594_v53 }
 0x81a   : > { %v1487_v30 = vadd.f32 %v1486_v25, %v1485_v19  ;;  %v1482_v58 = vadd.f32 %v1481_v37, %v1480_v13 }
 0x81b   : > { %v1492_v16 = vsel %vm768_vm2, %v1466_v27, 0.0  ;;  %v1813_v29 = vsel %vm1211_vm5, %v1794_v49, %v1812_v0 }
 0x81c   : > { %v1493_v31 = vrot.slane %v1492_v16, 4  ;;  %v1446_v32 = vpop.permute.xlu0 %1445  ;;  %v1488_v40 = vrot.slane %v1487_v30, 2  ;;  %v1483_v56 = vrot.slane %v1482_v58, 1 }
 0x81d   : > { %v1467_v34 = vmul.f32 %v1446_v32, %v3574_v35  ;;  %v1475_v35 = vadd.f32 %v1474_v36, %v1473_v28  ;;  %v1798_v59 = vrot.slane %v1446_v32, %v3594_v53 }
 0x81e   : > { %v1494_v23 = vadd.f32 %v1493_v31, %v1492_v16  ;;  %v1489_v63 = vadd.f32 %v1488_v40, %v1487_v30  ;;  %v1484_v7 = vadd.f32 %v1483_v56, %v1482_v58 }
 0x81f   : > { %v1499_v42 = vsel %vm768_vm2, %v1467_v34, 0.0  ;;  %v1476_v38 = vrot.slane %v1475_v35, 1  ;;  %v1814_v9 = vsel %vm1213_vm6, %v1798_v59, %v1813_v29 }
 0x820   : > { %v1495_v22 = vrot.slane %v1494_v23, 2  ;;  %v1451_v46 = vpop.permute.xlu0 %1450  ;;  %v1500_v51 = vrot.slane %v1499_v42, 4  ;;  %v1490_v62 = vrot.slane %v1489_v63, 1  ;;  %v1528_v31 = vpack.c.bf16 %v1484_v7, %v1484_v7 }
 0x821   : > { %v1468_v52 = vmul.f32 %v1451_v46, %v3572_v33  ;;  %v1802_v24 = vrot.slane %v1451_v46, %v3594_v53  ;;  %v1477_v15 = vadd.f32 %v1476_v38, %v1475_v35 }
 0x822   : > { %v1501_v4 = vadd.f32 %v1500_v51, %v1499_v42  ;;  %v1496_v21 = vadd.f32 %v1495_v22, %v1494_v23  ;;  %v1491_v19 = vadd.f32 %v1490_v62, %v1489_v63  ;;  %v1604_v22 = vunpack.c.l.b16 %v1528_v31 }
 0x823   : > { %v1506_v20 = vsel %vm768_vm2, %v1468_v52, 0.0  ;;  %v1815_v2 = vsel %vm1215_vm7, %v1802_v24, %v1814_v9  ;;  %v1527_v34 = vpack.c.bf16 %v1477_v15, %v1477_v15  ;;  %v1833_v42 = vsel %vm1207_vm3, %v1484_v7, %v1477_v15 }
 0x824   : > { %v1456_v1 = vpop.permute.xlu0 %1455  ;;  %v1502_v54 = vrot.slane %v1501_v4, 2  ;;  %v1507_v33 = vrot.slane %v1506_v20, 4  ;;  %v1497_v55 = vrot.slane %v1496_v21, 1  ;;  %v1529_v36 = vpack.c.bf16 %v1491_v19, %v1491_v19 }
 0x825   : > { %v1469_v8 = vmul.f32 %v1456_v1, %v3584_v43  ;;  %v1806_v44 = vrot.slane %v1456_v1, %v3594_v53  ;;  %v1603_v51 = vunpack.c.l.b16 %v1527_v34  ;;  %v1834_v35 = vsel %vm1209_vm4, %v1491_v19, %v1833_v42 }
 0x826   : > { %v1503_v10 = vadd.f32 %v1502_v54, %v1501_v4  ;;  %v1508_v57 = vadd.f32 %v1507_v33, %v1506_v20  ;;  %v1498_v28 = vadd.f32 %v1497_v55, %v1496_v21  ;;  %v1605_v52 = vunpack.c.l.b16 %v1529_v36  ;;  %v2463_v55 = vld [vmem:[%s3982_s17] sm:$0xff]  }
 0x827   : > { %v1513_v48 = vsel %vm768_vm2, %v1469_v8, 0.0  ;;  %v1816_v18 = vsel %vm1217_vm8, %v1806_v44, %v1815_v2  ;;  %v1611_v0 = vsel %vm1207_vm3, %v1604_v22, %v1603_v51  ;;  %2261 = vmatpush3.bf16.msra.mxu0 %v2463_v55  ;;  %v2464_v2 = vld [vmem:[%s3982_s17 + $0x8] sm:$0xff]  }
 0x828   : > { %v1514_v11 = vrot.slane %v1513_v48, 4  ;;  %v1461_v12 = vpop.permute.xlu0 %1460  ;;  %v1504_v5 = vrot.slane %v1503_v10, 1  ;;  %v1509_v14 = vrot.slane %v1508_v57, 2  ;;  %v1530_v23 = vpack.c.bf16 %v1498_v28, %v1498_v28  ;;  %2262 = vmatprep.subr.bf16.mxu0 %v3016_v3 }
 0x829   : > { %v1470_v43 = vmul.f32 %v1461_v12, %v3581_v41  ;;  %v1810_v6 = vrot.slane %v1461_v12, %v3594_v53  ;;  %v1835_v59 = vsel %vm1211_vm5, %v1498_v28, %v1834_v35  ;;  %v1612_v29 = vsel %vm1209_vm4, %v1605_v52, %v1611_v0  ;;  %v2466_v12 = vld [vmem:[%s3982_s17 + $0x18] sm:$0xff]  }
 0x82a   : > { %v1515_v17 = vadd.f32 %v1514_v11, %v1513_v48  ;;  %v1510_v25 = vadd.f32 %v1509_v14, %v1508_v57  ;;  %v1505_v16 = vadd.f32 %v1504_v5, %v1503_v10  ;;  %v1606_v58 = vunpack.c.l.b16 %v1530_v23  ;;  %v2465_v11 = vld [vmem:[%s3982_s17 + $0x10] sm:$0xff]   ;;  %v2171_v14 = vld [vmem:[#allocation21] ss:$0 sm:$0xff] }
 0x82b   : > { %v1520_v26 = vsel %vm768_vm2, %v1470_v43, 0.0  ;;  %v1817_v27 = vsel %vm1219_vm9, %v1810_v6, %v1816_v18  ;;  %2263 = vmatpush3.bf16.msra.mxu0 %v2464_v2 }
 0x82c   : > { %v1516_v13 = vrot.slane %v1515_v17, 2  ;;  %v1521_v30 = vrot.slane %v1520_v26, 4  ;;  %1819 = vst.msk [vmem:[%s3487_s24] sm:$0xff] %vm1222_vm10, %v1817_v27  ;;  %v1511_v41 = vrot.slane %v1510_v25, 1  ;;  %v1531_v45 = vpack.c.bf16 %v1505_v16, %v1505_v16  ;;  %2264 = vmatprep.subr.bf16.mxu0 %v3016_v3 }
 0x82d   : > { %v1836_v20 = vsel %vm1213_vm6, %v1505_v16, %v1835_v59  ;;  %v1613_v8 = vsel %vm1211_vm5, %v1606_v58, %v1612_v29 }
 0x82e   : > { %v1517_v53 = vadd.f32 %v1516_v13, %v1515_v17  ;;  %v1522_v32 = vadd.f32 %v1521_v30, %v1520_v26  ;;  %v1512_v37 = vadd.f32 %v1511_v41, %v1510_v25  ;;  %v1607_v4 = vunpack.c.l.b16 %v1531_v45  ;;  %v2172_v25 = vld [vmem:[%s3983_s3] ss:$0 sm:$0xff] }
 0x82f   : > { %2265 = vmatpush3.bf16.msra.mxu0 %v2465_v11 }
 0x830   : > { %v1518_v39 = vrot.slane %v1517_v53, 1  ;;  %v1523_v40 = vrot.slane %v1522_v32, 2  ;;  %v1532_v46 = vpack.c.bf16 %v1512_v37, %v1512_v37  ;;  %v1837_v24 = vsel %vm1215_vm7, %v1512_v37, %v1836_v20  ;;  %2266 = vmatprep.subr.bf16.mxu0 %v3016_v3 }
 0x831   : > { %v1614_v9 = vsel %vm1213_vm6, %v1607_v4, %v1613_v8 }
 0x832   : > { %v1519_v47 = vadd.f32 %v1518_v39, %v1517_v53  ;;  %v1524_v49 = vadd.f32 %v1523_v40, %v1522_v32  ;;  %v1608_v21 = vunpack.c.l.b16 %v1532_v46 }
 0x833   : > { %2267 = vmatpush3.bf16.msra.mxu0 %v2466_v12 }
 0x834   : > { %v1533_v61 = vpack.c.bf16 %v1519_v47, %v1519_v47  ;;  %v1525_v63 = vrot.slane %v1524_v49, 1  ;;  %v1838_v33 = vsel %vm1217_vm8, %v1519_v47, %v1837_v24  ;;  %v1615_v44 = vsel %vm1215_vm7, %v1608_v21, %v1614_v9 }
 0x836   : > { %v1526_v1 = vadd.f32 %v1525_v63, %v1524_v49  ;;  %v1609_v54 = vunpack.c.l.b16 %v1533_v61 }
 0x838   : > { %v1534_v38 = vpack.c.bf16 %v1526_v1, %v1526_v1  ;;  %v1839_v56 = vsel %vm1219_vm9, %v1526_v1, %v1838_v33  ;;  %v1616_v10 = vsel %vm1217_vm8, %v1609_v54, %v1615_v44 }
 0x839   : > { %1841 = vst.msk [vmem:[#allocation3] sm:$0xff] %vm768_vm2, %v1839_v56  ;;  %1847 = vst.msk [vmem:[#allocation26] sm:$0xff] (!%p2178_p1), %vm768_vm2, %v1839_v56 }
 0x83a   : > { %v1610_v62 = vunpack.c.l.b16 %v1534_v38 }
 0x83c   : > { %v1617_v57 = vsel %vm1219_vm9, %v1610_v62, %v1616_v10 }
 0x83d   : > { %v1618_v48 = vpack.c.b16 %v1617_v57, %v1617_v57 }
 0x83f   : > { %2257 = vmatmul.mubr.msk.bf16.vlgmr.msra.gmra.mrb[12].mxu1 %vm768_vm2, %v1618_v48 }
 0x912   : > { %v1668_v5 = vpop.f32.mrb[12].mxu1 }
 0x913   : > { %v1669_v43 = vadd.f32 %v1668_v5, %v3547_v60  ;;  %v2258_v6 = vpop.f32.mrb[13].mxu1 }
 0x914   : > { %v1671_v15 = vpop.f32.mrb[14].mxu1 }
 0x915   : > { %v1681_v7 = vadd.f32 %v2171_v14, %v1669_v43  ;;  %v2259_v17 = vpop.f32.mrb[15].mxu1 }
 0x917   : > { %2505 = vtanh.f32 %v1681_v7 }
 0x921   : > { %v2506_v18 = vpop.eup %2505 }
 0x922   : > { %v1683_v19 = vpack.c.bf16 %v2506_v18, %v2506_v18 }
 0x924   : > { %2269 = vmatmul.mubr.msk.bf16.vlgmr.msra.gmra.mrb[8].mxu0 %vm1723_vm11, %v1683_v19 }
 0x9f7   : > { %v1761_v26 = vpop.f32.mrb[8].mxu0 }
 0x9f8   : > { %v1762_v3 = vadd.f32 %v2172_v25, %v1761_v26  ;;  %v2270_v27 = vpop.f32.mrb[9].mxu0 }
 0x9f9   : > { %v1764_v28 = vpop.f32.mrb[10].mxu0 }
 0x9fa   : > { %1767 = vmax.xlane.f32.xlu1 %v1762_v3  ;;  %v2271_v13 = vpop.f32.mrb[11].mxu0 }
 0xa0b   : > { %1821 = vrot.lane.b32.xlu1 %v3532_v50, %s3019_s22 }
 0xa87   : > { %v1768_v60 = vpop.xlane.xlu1 %1767 }
 0xa88   : > { %v1769_v30 = vsub.f32 %v1762_v3, %v1768_v60 }
 0xa8a   : > { %v1770_v16 = vmul.f32 1.442695, %v1769_v30 }
 0xa8b   : > { %v1822_v41 = vpop.permute.xlu1 %1821 }
 0xa8c   : > { %2507 = vpow2.f32 %v1770_v16  ;;  %1824 = vst.msk [vmem:[#allocation2] sm:$0xff] %vm768_vm2, %v1822_v41  ;;  %1846 = vst.msk [vmem:[#allocation25] sm:$0xff] (!%p2178_p1), %vm768_vm2, %v1822_v41 }
 0xa96   : > { %v2508_v31 = vpop.eup %2507 }
 0xa97   : > { %1772 = vadd.xlane.f32.xlu0 %v2508_v31 }
 0xb24   : > { %v1773_v53 = vpop.xlane.xlu0 %1772 }
 0xb25   : > { %2509 = vlog2.f32 %v1773_v53 }
 0xb2f   : > { %v2510_v32 = vpop.eup %2509 }
 0xb30   : > { %v1775_v34 = vmul.f32 0.6931472, %v2510_v32  ;;  %1845 = sbr.rel (%p2178_p1) target bundleno = 2871 (0xb37), region = 132 }
 0xb32   : > { %v1776_v36 = vadd.f32 %v1775_v34, %v1768_v60 }
 0xb34   : > { %v1777_v37 = vsub.f32 %v1762_v3, %v1776_v36 }
 0xb36   : > { %1778 = vst [vmem:[%s3485_s2] sm:$0xff] %v1777_v37 }
 0xb37 PF: > { %s1853_s22 = sand.u32 1, %s3143_s1   ;;  %s2181_s19 = sshll.u32 %s3143_s1, 7 }
 0xb38   : > { %s3984_s13 = sld [smem:[#allocation51_spill]]  ;;  %s1880_s8 = sshll.u32 %s3487_s24, 4  ;;  %s3781_s8 = int_to_ptr.vmem [resolvable:$true] %s1880_s8 }
 0xb39   : > { %s3985_s5 = sld [smem:[#allocation50_spill]]  ;;  %s1854_s7 = scalar_lea.sflag [#allocation24], %s1853_s22 }
 0xb3a   : > { %s2821_s9 = scalar_lea.vmem %s3781_s8, 128  ;;  %p3986_p10 = scmp.ne.s32.totalorder %s3964_s23, 0 }
 0xb3b   : > { %p2822_p4 = scmp.ne.s32.totalorder %s3781_s8, %s2821_s9  ;;  %s3023_s15 = smov [#allocation23]  }
 0xb3c   : > { %s2825_s16 = sshll.u32 %s3023_s15, 4  ;;  %s2826_s16 = int_to_ptr.vmem [resolvable:$false] %s2825_s16 }
 0xb3d   : > { %p2823_p13 = pnand %p2822_p4, %p3986_p10  ;;  %s2827_s24 = scalar_lea.vmem %s2826_s16, 256 }
 0xb3e   : > { %s3778_s20 = scalar_lea.hbm %s3984_s13, %s2181_s19  ;;  %p2828_p2 = scmp.lt.s32.totalorder %s3781_s8, %s2826_s16 }
 0xb3f   : > { %s3786_s6 = scalar_lea.hbm %s3985_s5, %s2181_s19  ;;  %p2824_p0 = pneg %p2823_p13 }
 0xb40   : > { %p2829_p8 = scmp.lt.s32.totalorder %s2827_s24, %s2821_s9 }
 0xb42   : > { %p2830_p9 = por %p2829_p8, %p2828_p2 }
 0xb44   : > { %p2831_p11 = pnand %p2830_p9, %p2824_p0 }
 0xb46   : > { %2834 = shalt.err (!%p2831_p11)
}
 0xb47   : > { %s2835_s22 = scalar_lea.hbm %s3778_s20, 128  ;;  %s2839_s3 = scalar_lea.hbm %s3984_s13, 512 }
 0xb48   : > { %p2836_p6 = scmp.ne.s32.totalorder %s3778_s20, %s2835_s22  ;;  %p2840_p7 = scmp.lt.u32.totalorder %s3778_s20, %s3984_s13 }
 0xb49   : > { %p2841_p3 = scmp.lt.u32.totalorder %s2839_s3, %s2835_s22  ;;  %p2843_p4 = scmp.lt.u32.totalorder %s2835_s22, %s3778_s20 }
 0xb4a   : > { %p2837_p12 = pnand %p2836_p6, %p3986_p10 }
 0xb4b   : > { %p2842_p1 = por %p2841_p3, %p2840_p7 }
 0xb4c   : > { %p2838_p5 = pneg %p2837_p12 }
 0xb4d   : > { %p2844_p13 = por %p2843_p4, %p2842_p1 }
 0xb4f   : > { %p2845_p0 = pnand %p2844_p13, %p2838_p5 }
 0xb51   : > { %2848 = shalt.err (!%p2845_p0)
}
 0xb52   : > { %2315 = dma.vmem_to_hbm [thread:$0]  (%p3986_p10), %s3781_s8, 128, %s3778_s20, %s1854_s7  }
 0xb53   : > { %s1867_s9 = sshll.u32 %s3485_s2, 4  ;;  %s3024_s24 = smov [#allocation25]   ;;  %s3810_s9 = int_to_ptr.vmem [resolvable:$true] %s1867_s9 }
 0xb54   : > { %s3812_s19 = sshll.u32 %s3024_s24, 4  ;;  %s1849_s22 = scalar_lea.sflag [#allocation6], %s3454_s4  ;;  %s1892_s19 = int_to_ptr.vmem [resolvable:$true] %s3812_s19 }
 0xb55   : > { %s2849_s0 = scalar_lea.vmem %s3810_s9, 128  ;;  %s3025_s3 = smov [#allocation22]  }
 0xb56   : > { %p2850_p2 = scmp.ne.s32.totalorder %s3810_s9, %s2849_s0  ;;  %s2853_s15 = sshll.u32 %s3025_s3, 4  ;;  %s2854_s15 = int_to_ptr.vmem [resolvable:$false] %s2853_s15 }
 0xb57   : > { %s2855_s16 = scalar_lea.vmem %s2854_s15, 256  ;;  %p2856_p11 = scmp.lt.s32.totalorder %s3810_s9, %s2854_s15 }
 0xb58   : > { %p2851_p8 = pnand %p2850_p2, %p3986_p10  ;;  %p2857_p6 = scmp.lt.s32.totalorder %s2855_s16, %s2849_s0 }
 0xb5a   : > { %p2852_p9 = pneg %p2851_p8  ;;  %p2858_p12 = por %p2857_p6, %p2856_p11 }
 0xb5c   : > { %p2859_p5 = pnand %p2858_p12, %p2852_p9 }
 0xb5e   : > { %2862 = shalt.err (!%p2859_p5)
}
 0xb5f   : > { %s2863_s7 = scalar_lea.hbm %s3786_s6, 128  ;;  %s2867_s20 = scalar_lea.hbm %s3985_s5, 512 }
 0xb60   : > { %p2864_p7 = scmp.ne.s32.totalorder %s3786_s6, %s2863_s7  ;;  %p2868_p4 = scmp.lt.u32.totalorder %s3786_s6, %s3985_s5 }
 0xb61   : > { %p2869_p13 = scmp.lt.u32.totalorder %s2867_s20, %s2863_s7  ;;  %p2871_p2 = scmp.lt.u32.totalorder %s2863_s7, %s3786_s6 }
 0xb62   : > { %p2865_p3 = pnand %p2864_p7, %p3986_p10 }
 0xb63   : > { %p2870_p0 = por %p2869_p13, %p2868_p4 }
 0xb64   : > { %p2866_p1 = pneg %p2865_p3 }
 0xb65   : > { %p2872_p8 = por %p2871_p2, %p2870_p0 }
 0xb67   : > { %p2873_p9 = pnand %p2872_p8, %p2866_p1 }
 0xb69   : > { %2876 = shalt.err (!%p2873_p9)
}
 0xb6a   : > { %2314 = dma.vmem_to_hbm [thread:$0]  (%p3986_p10), %s3810_s9, 128, %s3786_s6, %s1849_s22  }
 0xb6b   : > { %s2877_s0 = scalar_lea.vmem %s1892_s19, 128  ;;  %p3987_p6 = scmp.eq.s32.totalorder %s3143_s1, 3 }
 0xb6c   : > { %p2878_p11 = scmp.ne.s32.totalorder %s1892_s19, %s2877_s0  ;;  %p2884_p7 = scmp.lt.s32.totalorder %s1892_s19, %s1892_s19 }
 0xb6d   : > { %p2885_p3 = scmp.lt.s32.totalorder %s2877_s0, %s2877_s0 }
 0xb6e   : > { %p2879_p12 = pnand %p2878_p11, %p3987_p6 }
 0xb6f   : > { %p2886_p4 = por %p2885_p3, %p2884_p7 }
 0xb70   : > { %p2880_p5 = pneg %p2879_p12 }
 0xb72   : > { %p2887_p13 = pnand %p2886_p4, %p2880_p5 }
 0xb74   : > { %2890 = shalt.err (!%p2887_p13)
}
 0xb75   : > { %s3988_s16 = sld [smem:[#allocation52_spill]]  ;;  %p3989_p1 = pmov %p3987_p6 }
 0xb7b   : > { %s2891_s23 = scalar_lea.hbm %s3988_s16, 128 }
 0xb7c   : > { %p2892_p10 = scmp.ne.s32.totalorder %s3988_s16, %s2891_s23  ;;  %p2897_p8 = scmp.lt.u32.totalorder %s2891_s23, %s3988_s16 }
 0xb7e   : > { %p2893_p0 = pnand %p2892_p10, %p3989_p1 }
 0xb80   : > { %p2894_p2 = pneg %p2893_p0 }
 0xb82   : > { %p2899_p9 = pnand %p2897_p8, %p2894_p2 }
 0xb84   : > { %2902 = shalt.err (!%p2899_p9)
}
 0xb85   : > { %p3990_p11 = pmov %p3989_p1  ;;  %s3026_s20 = smov [#allocation26]  }
 0xb86   : > { %s1902_s8 = sshll.u32 %s3026_s20, 4  ;;  %p3991_p12 = pmov %p3989_p1  ;;  %s1903_s8 = int_to_ptr.vmem [resolvable:$true] %s1902_s8 }
 0xb87   : > { %2317 = dma.vmem_to_hbm [thread:$0]  (%p3990_p11), %s1892_s19, 128, %s3988_s16, [#allocation24]  }
 0xb88   : > { %s2903_s24 = scalar_lea.vmem %s1903_s8, 128  ;;  %p2910_p3 = scmp.lt.s32.totalorder %s1903_s8, %s1903_s8 }
 0xb89   : > { %p2904_p6 = scmp.ne.s32.totalorder %s1903_s8, %s2903_s24  ;;  %p2911_p4 = scmp.lt.s32.totalorder %s2903_s24, %s2903_s24 }
 0xb8b   : > { %p2905_p5 = pnand %p2904_p6, %p3991_p12  ;;  %p2912_p13 = por %p2911_p4, %p2910_p3 }
 0xb8d   : > { %p2906_p7 = pneg %p2905_p5 }
 0xb8f   : > { %p2913_p10 = pnand %p2912_p13, %p2906_p7 }
 0xb91   : > { %2916 = shalt.err (!%p2913_p10)
}
 0xb92   : > { %s3992_s15 = sld [smem:[#allocation53_spill]]  ;;  %p3993_p0 = pmov %p3990_p11 }
 0xb98   : > { %s2917_s23 = scalar_lea.hbm %s3992_s15, 128 }
 0xb99   : > { %p2918_p1 = scmp.ne.s32.totalorder %s3992_s15, %s2917_s23  ;;  %p2923_p9 = scmp.lt.u32.totalorder %s2917_s23, %s3992_s15 }
 0xb9b   : > { %p2919_p2 = pnand %p2918_p1, %p3993_p0 }
 0xb9d   : > { %p2920_p8 = pneg %p2919_p2 }
 0xb9f   : > { %p2925_p11 = pnand %p2923_p9, %p2920_p8 }
 0xba1   : > { %2928 = shalt.err (!%p2925_p11)
}
 0xba2   : > { %p3994_p6 = pmov %p3993_p0  ;;  %p3995_p12 = pmov %p3993_p0 }
 0xba4   : > { %2319 = dma.vmem_to_hbm [thread:$0]  (%p3994_p6), %s1903_s8, 128, %s3992_s15, [#allocation27]  }
 0xba5   : > { %2970 = dma.done.wait (%p3995_p12), [#allocation24], 128   ;;  %p3996_p5 = pmov %p3993_p0 }
 0xba6   : > { %p3997_p7 = pmov %p3993_p0 }
 0xba7   : > { %2972 = vsyncadd (%p3996_p5), [#allocation24], 4294967168 }
 0xba8   : > { %2974 = dma.done.wait (%p3997_p7), [#allocation27], 128   ;;  %p3998_p3 = pmov %p3993_p0 }
 0xbaa   : > { %2976 = vsyncadd (%p3998_p3), [#allocation27], 4294967168 }
 0xbab PF: > { %p2393_p4 = scmp.ge.s32.totalorder %s2999_s30, 2  ;;  %s1922_s2 = sand.u32 1, %s2987_s27  }
 0xbac   : > { %p3999_p13 = scmp.ne.s32.totalorder %s3965_s25, 0  ;;  %s1923_s20 = scalar_lea.sflag [#allocation6], %s1922_s2 }
 0xbae   : > { %p2362_p10 = pnand %p2393_p4, %p3999_p13 }
 0xbb0   : > { %2978 = dma.done.wait (!%p2362_p10), %s1923_s20, 128  }
 0xbb1   : > { %2980 = vsyncadd (!%p2362_p10), %s1923_s20, 4294967168  ;;  %s4000_s8 = sadd.s32 4294967294, %s2999_s30  }
 0xbb2   : > { %s1931_s24 = sand.u32 1, %s4000_s8  }
 0xbb3   : > { %s1932_s0 = scalar_lea.sflag [#allocation24], %s1931_s24 }
 0xbb4   : > { %2982 = dma.done.wait (!%p2362_p10), %s1932_s0, 128  }
 0xbb5   : > { %2984 = vsyncadd (!%p2362_p10), %s1932_s0, 4294967168  ;;  %p41_p1 = scmp.ge.s32.totalorder %s3374_s21, 6   ;;  %s4001_s27 = smov %s2991_s28 }
 0xbb6   : > { %s4002_s28 = smov %s2995_s29  ;;  %s4003_s29 = smov %s3385_s26 }
 0xbb7   : > { %s4004_s30 = smov %s3374_s21  ;;  %43 = sbr.rel (!%p41_p1) target bundleno = 30 (0x1e), region = 206 }
 0xbbe   :  { %1937 = vsyncpa [#allocation5], 1 }
 0xbbf   :  { %1939 = vsyncpa [#allocation5 + $0x1], 1 }
 0xbc0   :  { %1940 = vsyncpa [#allocation8], 1 }
 0xbc1   :  { %1941 = vsyncpa [#allocation11], 1 }
 0xbc2   :  { %1942 = vsyncpa [#allocation14], 1 }
 0xbc3   :  { %1943 = vsyncpa [#allocation17], 1 }
 0xbc4   :  { %1944 = vsyncpa [#allocation20], 1 }
 0xbc5   :  { %1945 = vsyncpa [#allocation6], 1 }
 0xbc6   :  { %1947 = vsyncpa [#allocation6 + $0x1], 1 }
 0xbc7   :  { %1948 = vsyncpa [#allocation24], 1 }
 0xbc8   :  { %1950 = vsyncpa [#allocation24 + $0x1], 1 }
 0xbc9   :  { %1951 = vsyncpa [#allocation27], 1 }

</bundles_post_ra>
